<compile_context>
chip_gen: v5e
topology: v5e:2x2
jax: 0.10.0
libtpu: 0.0.40
codegen_flags: <defaults>
</compile_context>

<pallas_src>
import math

import jax
import jax.numpy as jnp
from jax import lax
from jax.experimental import pallas as pl
from jax.experimental.pallas import tpu as pltpu


_VMEM_LIMIT = 48 * 1024 * 1024     # safe on v5e/v6e (128 MiB) and v7x (64 MiB)
_NEG_INF = -1e30                   # plain Python float (no captured constants)


def _pick_tile(dim, pref, align):
    """Largest multiple of `align` <= pref that divides `dim`."""
    if dim <= pref:
        return dim
    t = (min(pref, dim) // align) * align
    while t >= align:
        if dim % t == 0:
            return t
        t -= align
    if align > 16:
        return _pick_tile(dim, pref, 16)
    # TODO(synk): use pl.cdiv grids + in-kernel masking instead of a full-dim
    # fallback for awkward (non power-of-two) dims.
    return dim


# ----------------------------------------------------------------------------
# Tiled linear projection:  y = x @ w   (w already stored as (K, N), bf16)
# ----------------------------------------------------------------------------
def linear(x, w, out_dtype=None, *, tm=512, tn=512, tk=1024):
    M, K = x.shape
    K2, N = w.shape
    assert K == K2
    out_dtype = out_dtype or x.dtype
    tm = _pick_tile(M, tm, 16)
    tn = _pick_tile(N, tn, 256)
    tk = _pick_tile(K, tk, 256)

    def kernel(x_ref, w_ref, o_ref, acc_ref):
        @pl.when(pl.program_id(2) == 0)
        def _init():
            acc_ref[...] = jnp.zeros(acc_ref.shape, acc_ref.dtype)

        a = x_ref[...].astype(jnp.bfloat16)     # feed the MXU bf16
        b = w_ref[...].astype(jnp.bfloat16)
        acc_ref[...] += jnp.dot(a, b, preferred_element_type=jnp.float32)

        @pl.when(pl.program_id(2) == pl.num_programs(2) - 1)
        def _done():
            o_ref[...] = acc_ref[...].astype(o_ref.dtype)

    return pl.pallas_call(
        kernel,
        out_shape=jax.ShapeDtypeStruct((M, N), out_dtype),
        grid_spec=pltpu.PrefetchScalarGridSpec(
            num_scalar_prefetch=0,
            grid=(M // tm, N // tn, K // tk),
            in_specs=[pl.BlockSpec((tm, tk), lambda i, j, k: (i, k)),
                      pl.BlockSpec((tk, tn), lambda i, j, k: (k, j))],
            out_specs=pl.BlockSpec((tm, tn), lambda i, j, k: (i, j)),
            scratch_shapes=[pltpu.VMEM((tm, tn), jnp.float32)],
        ),
        compiler_params=pltpu.CompilerParams(
            dimension_semantics=("parallel", "parallel", "arbitrary"),
            vmem_limit_bytes=_VMEM_LIMIT),
    )(x, w)


# ----------------------------------------------------------------------------
# RoPE pre-pass: rotate the Q and K columns of the fused qkv buffer once.
# Grid (B, S-blocks, Q/K heads); head axis innermost so cos/sin tiles are not
# re-DMA'd per head.
# ----------------------------------------------------------------------------
def rope_qk(qkv, cos, sin, B, S, n_heads, n_kv_heads, head_dim, *, row_block=256):
    M = B * S
    D = head_dim
    half = D // 2
    nqk = n_heads + n_kv_heads
    tm = _pick_tile(S, row_block, 16)
    nsb = S // tm
    cosf = cos.astype(jnp.float32)
    sinf = sin.astype(jnp.float32)

    def kernel(x_ref, c_ref, s_ref, o_ref):
        x = x_ref[...].astype(jnp.float32)
        x1 = x[:, :half]
        x2 = x[:, half:]
        c = c_ref[...]
        s = s_ref[...]
        # rotate_half folded into per-half elementwise ops (no roll / concat).
        o_ref[:, :half] = (x1 * c[:, :half] - x2 * s[:, :half]).astype(o_ref.dtype)
        o_ref[:, half:] = (x2 * c[:, half:] + x1 * s[:, half:]).astype(o_ref.dtype)

    return pl.pallas_call(
        kernel,
        out_shape=jax.ShapeDtypeStruct((M, nqk * D), qkv.dtype),
        grid_spec=pltpu.PrefetchScalarGridSpec(
            num_scalar_prefetch=0,
            grid=(B, nsb, nqk),
            in_specs=[
                pl.BlockSpec((tm, D), lambda b, i, h: (b * nsb + i, h)),
                pl.BlockSpec((tm, D), lambda b, i, h: (i, 0)),
                pl.BlockSpec((tm, D), lambda b, i, h: (i, 0)),
            ],
            out_specs=pl.BlockSpec((tm, D), lambda b, i, h: (b * nsb + i, h)),
        ),
        compiler_params=pltpu.CompilerParams(
            dimension_semantics=("parallel", "parallel", "parallel"),
            vmem_limit_bytes=_VMEM_LIMIT),
    )(qkv, cosf, sinf)


# ----------------------------------------------------------------------------
# Flash-style causal attention.
#   * grid (B, nKV, lower-triangular (qi,ki) pairs)  -> no wasted steps/DMA
#   * scalar-prefetched qi/ki lookup tables drive the index_maps
#   * one K/V tile is shared by the n_rep query heads of its KV group
#   * Q is pre-rotated & pre-scaled; K pre-rotated (rope_qk pre-pass)
# ----------------------------------------------------------------------------
def flash_attention(qk_rot, qkv, B, S, n_heads, n_kv_heads, head_dim,
                    *, q_block=256, kv_block=512):
    M = B * S
    D = head_dim
    n_rep = n_heads // n_kv_heads
    GD = n_rep * D
    tq = _pick_tile(S, q_block, 16)
    tk = _pick_tile(S, kv_block, 16)
    nqb = S // tq
    nkb = S // tk

    # Enumerate only the causal (lower-triangular) block pairs.
    qi_list, ki_list = [], []
    for qi in range(nqb):
        q_end = (qi + 1) * tq
        for ki in range((q_end + tk - 1) // tk):
            qi_list.append(qi)
            ki_list.append(ki)
    n_pairs = len(qi_list)
    qi_ids = jnp.asarray(qi_list, dtype=jnp.int32)
    ki_ids = jnp.asarray(ki_list, dtype=jnp.int32)

    def kernel(qi_ref, ki_ref, q_ref, k_ref, v_ref, o_ref, m_sc, l_sc, acc_sc):
        p = pl.program_id(2)
        qi = qi_ref[p]
        ki = ki_ref[p]

        @pl.when(ki == 0)
        def _init():
            m_sc[...] = jnp.full(m_sc.shape, _NEG_INF, m_sc.dtype)
            l_sc[...] = jnp.zeros(l_sc.shape, l_sc.dtype)
            acc_sc[...] = jnp.zeros(acc_sc.shape, acc_sc.dtype)

        k = k_ref[...]                               # (tk, D) bf16, pre-rotated
        v = v_ref[...]                               # (tk, D) bf16
        rows = qi * tq + lax.broadcasted_iota(jnp.int32, (tq, tk), 0)
        cols = ki * tk + lax.broadcasted_iota(jnp.int32, (tq, tk), 1)
        causal_mask = cols > rows                    # all-False on interior blocks

        for r in range(n_rep):                       # query heads of this KV group
            lo = r * D
            hi = (r + 1) * D
            s = lax.dot_general(q_ref[:, lo:hi], k,
                                dimension_numbers=(((1,), (1,)), ((), ())),
                                preferred_element_type=jnp.float32)
            s = jnp.where(causal_mask, _NEG_INF, s)
            m_prev = m_sc[r]
            m_new = jnp.maximum(m_prev, s.max(axis=-1, keepdims=True))
            alpha = jnp.exp(m_prev - m_new)
            p_mat = jnp.exp(s - m_new)
            l_sc[r] = alpha * l_sc[r] + p_mat.sum(axis=-1, keepdims=True)
            acc_sc[:, lo:hi] = alpha * acc_sc[:, lo:hi] + jnp.dot(
                p_mat.astype(v.dtype), v, preferred_element_type=jnp.float32)
            m_sc[r] = m_new

        last_ki = ((qi + 1) * tq - 1) // tk
        @pl.when(ki == last_ki)
        def _finalize():
            for r in range(n_rep):
                lo = r * D
                hi = (r + 1) * D
                o_ref[:, lo:hi] = (acc_sc[:, lo:hi] / l_sc[r]).astype(o_ref.dtype)

    q_spec = pl.BlockSpec((tq, GD),
                          lambda b, g, pi, qi_r, ki_r: (b * nqb + qi_r[pi], g))
    k_spec = pl.BlockSpec((tk, D),
                          lambda b, g, pi, qi_r, ki_r:
                          (b * nkb + ki_r[pi], n_heads + g))
    v_spec = pl.BlockSpec((tk, D),
                          lambda b, g, pi, qi_r, ki_r:
                          (b * nkb + ki_r[pi], n_heads + n_kv_heads + g))
    o_spec = pl.BlockSpec((tq, GD),
                          lambda b, g, pi, qi_r, ki_r: (b * nqb + qi_r[pi], g))

    return pl.pallas_call(
        kernel,
        out_shape=jax.ShapeDtypeStruct((M, n_heads * D), qk_rot.dtype),
        grid_spec=pltpu.PrefetchScalarGridSpec(
            num_scalar_prefetch=2,
            grid=(B, n_kv_heads, n_pairs),
            in_specs=[q_spec, k_spec, v_spec],
            out_specs=o_spec,
            scratch_shapes=[
                pltpu.VMEM((n_rep, tq, 1), jnp.float32),   # running max per head
                pltpu.VMEM((n_rep, tq, 1), jnp.float32),   # running denom per head
                pltpu.VMEM((tq, GD), jnp.float32),         # running accumulator
            ],
        ),
        compiler_params=pltpu.CompilerParams(
            dimension_semantics=("parallel", "parallel", "arbitrary"),
            vmem_limit_bytes=_VMEM_LIMIT),
    )(qi_ids, ki_ids, qk_rot, qk_rot, qkv)


# ----------------------------------------------------------------------------
# Weight preparation (once per model, not per forward call)
# ----------------------------------------------------------------------------
def prepare_attention_params(wq, wk, wv, wo, n_heads, dtype=jnp.bfloat16):
    head_dim = wq.shape[0] // n_heads
    sm_scale = 1.0 / math.sqrt(head_dim)
    # Fold softmax scale into the Q projection; store fused weights already
    # transposed to (in_features, out_features) so the matmul kernel is NN.
    w_qkv_t = jnp.concatenate([wq * sm_scale, wk, wv], axis=0).T.astype(dtype)
    wo_t = wo.T.astype(dtype)
    return {"w_qkv_t": w_qkv_t, "wo_t": wo_t}


# ----------------------------------------------------------------------------
# Full Attention forward (eval mode)
# ----------------------------------------------------------------------------
def attention_forward(x, cos, sin, params, n_heads, n_kv_heads,
                      *, q_block=256, kv_block=512):
    B, S, H = x.shape
    w_qkv_t = params["w_qkv_t"]
    wo_t = params["wo_t"]
    D = w_qkv_t.shape[1] // (n_heads + 2 * n_kv_heads)
    assert n_heads % n_kv_heads == 0
    # TODO(synk): support head_dim that is not a multiple of 128 (would need a
    # different column-tiling for the fused QKV buffer).
    assert D % 128 == 0, "this kernel layout requires head_dim % 128 == 0"

    M = B * S
    x2d = x.reshape(M, H)

    # Fused Q/K/V projection (single pass over x), bf16 output.
    qkv = linear(x2d, w_qkv_t, out_dtype=jnp.bfloat16)          # (M, (nH+2nKV)*D)

    # One-shot RoPE on the Q and K columns (Q already carries the 1/sqrt(D)).
    cos_s = cos[:S]
    sin_s = sin[:S]
    qk_rot = rope_qk(qkv, cos_s, sin_s, B, S, n_heads, n_kv_heads, D)

    # Flash attention straight off the fused buffers, head-major output.
    attn = flash_attention(qk_rot, qkv, B, S, n_heads, n_kv_heads, D,
                           q_block=q_block, kv_block=kv_block)  # (M, nH*D)

    # Output projection; dropout is identity in eval mode, past_kv path unused.
    out = linear(attn, wo_t, out_dtype=x.dtype)                 # (M, H)
    return out.reshape(B, S, H)


# ----------------------------------------------------------------------------
# Pure-JAX reference (mirrors the PyTorch math) for the correctness check
# ----------------------------------------------------------------------------
def reference_forward(x, cos, sin, wq, wk, wv, wo, n_heads, n_kv_heads):
    B, S, H = x.shape
    head_dim = wq.shape[0] // n_heads
    n_rep = n_heads // n_kv_heads

    xq = (x @ wq.T).reshape(B, S, n_heads, head_dim)
    xk = (x @ wk.T).reshape(B, S, n_kv_heads, head_dim)
    xv = (x @ wv.T).reshape(B, S, n_kv_heads, head_dim)

    def rotate_half(t):
        h = t.shape[-1] // 2
        return jnp.concatenate([-t[..., h:], t[..., :h]], axis=-1)

    c = cos[None, :, None, :]
    s = sin[None, :, None, :]
    xq = xq * c + rotate_half(xq) * s
    xk = xk * c + rotate_half(xk) * s

    def repeat_kv(t):
        b, sl, kvh, d = t.shape
        return jnp.broadcast_to(
            t[:, :, :, None, :], (b, sl, kvh, n_rep, d)
        ).reshape(b, sl, kvh * n_rep, d)

    q = jnp.transpose(xq, (0, 2, 1, 3))
    k = jnp.transpose(repeat_kv(xk), (0, 2, 1, 3))
    v = jnp.transpose(repeat_kv(xv), (0, 2, 1, 3))

    scores = jnp.einsum("bhqd,bhkd->bhqk", q, k) / math.sqrt(head_dim)
    mask = jnp.triu(jnp.full((S, S), -jnp.inf), k=1)
    scores = scores + mask[None, None]
    probs = jax.nn.softmax(scores.astype(jnp.float32), axis=-1).astype(q.dtype)
    out = jnp.einsum("bhqk,bhkd->bhqd", probs, v)
    out = jnp.transpose(out, (0, 2, 1, 3)).reshape(B, S, n_heads * head_dim)
    return out @ wo.T


if __name__ == "__main__":
    # Small config consistent with DeciMindConfig semantics; head_dim = 128
    # keeps the per-head column blocks lane-dense; small q/kv blocks exercise
    # the causal pair enumeration, init/finalize and GQA head grouping.
    B, S = 2, 32
    hidden_size = 512
    n_heads = 4
    n_kv_heads = 2
    head_dim = hidden_size // n_heads
    rope_theta = 1000000.0

    key = jax.random.PRNGKey(0)
    k_x, k_q, k_k, k_v, k_o = jax.random.split(key, 5)

    x = jax.random.normal(k_x, (B, S, hidden_size), dtype=jnp.float32)
    scale = 1.0 / math.sqrt(hidden_size)
    wq = jax.random.normal(k_q, (n_heads * head_dim, hidden_size), jnp.float32) * scale
    wk = jax.random.normal(k_k, (n_kv_heads * head_dim, hidden_size), jnp.float32) * scale
    wv = jax.random.normal(k_v, (n_kv_heads * head_dim, hidden_size), jnp.float32) * scale
    wo = jax.random.normal(k_o, (hidden_size, n_heads * head_dim), jnp.float32) * scale

    # Rotary position embeddings (HF-style: cos/sin over the full head_dim).
    inv_freq = 1.0 / (rope_theta ** (jnp.arange(0, head_dim, 2, dtype=jnp.float32) / head_dim))
    pos = jnp.arange(S, dtype=jnp.float32)
    freqs = pos[:, None] * inv_freq[None, :]
    emb = jnp.concatenate([freqs, freqs], axis=-1)
    cos = jnp.cos(emb)
    sin = jnp.sin(emb)

    params = prepare_attention_params(wq, wk, wv, wo, n_heads)
    out = attention_forward(x, cos, sin, params, n_heads, n_kv_heads,
                            q_block=16, kv_block=16)
    out = jax.block_until_ready(out)

    # Reference on bf16-rounded operands (matches the kernel's MXU operand
    # precision); all accumulation in f32.
    rnd = lambda a: a.astype(jnp.bfloat16).astype(jnp.float32)
    ref = reference_forward(rnd(x), cos, sin, rnd(wq), rnd(wk), rnd(wv), rnd(wo),
                            n_heads, n_kv_heads)

    assert out.shape == (B, S, hidden_size)
    assert out.dtype == x.dtype
    max_err = float(jnp.max(jnp.abs(out - ref)))
    assert jnp.allclose(out, ref, atol=5e-2, rtol=5e-2), f"max abs err {max_err}"

    print("KERNEL_OK")
</pallas_src>

<mosaic_0001>
module attributes {stable_mosaic.version = 11 : i64} {
  func.func @kernel(%arg0: i32, %arg1: i32, %arg2: i32, %arg3: memref<64x512xf32, #tpu.memory_space<vmem>>, %arg4: memref<512x512xbf16, #tpu.memory_space<vmem>>, %arg5: memref<64x512xbf16, #tpu.memory_space<vmem>>, %arg6: memref<64x512xf32, #tpu.memory_space<vmem>>) attributes {dimension_semantics = [#tpu.dimension_semantics<parallel>, #tpu.dimension_semantics<parallel>, #tpu.dimension_semantics<arbitrary>], iteration_bounds = array<i64: 1, 2, 1>, scalar_prefetch = 0 : i64, scratch_operands = 1 : i64, tpu.core_type = #tpu.core_type<tc>, window_params = [{transform_indices = @transform_0, window_bounds = array<i64: 64, 512>}, {transform_indices = @transform_1, window_bounds = array<i64: 512, 512>}, {transform_indices = @transform_2, window_bounds = array<i64: 64, 512>}]} {
    %c0_i32 = arith.constant 0 : i32
    %0 = arith.cmpi eq, %arg2, %c0_i32 : i32
    %1 = arith.extui %0 : i1 to i32
    %c0_i32_0 = arith.constant 0 : i32
    %2 = arith.cmpi ne, %1, %c0_i32_0 : i32
    scf.if %2 {
      %cst_10 = arith.constant 0.000000e+00 : f32
      %13 = vector.broadcast %cst_10 : f32 to vector<64x512xf32>
      %c0_11 = arith.constant 0 : index
      %c0_12 = arith.constant 0 : index
      %14 = vector.load %arg6[%c0_11, %c0_12] : memref<64x512xf32, #tpu.memory_space<vmem>>, vector<64x512xf32>
      tpu.vector_store %arg6[%c0_11, %c0_12], %13 {strides = array<i32>} : memref<64x512xf32, #tpu.memory_space<vmem>>, vector<64x512xf32>,
    } else {
    }
    %c0 = arith.constant 0 : index
    %c0_1 = arith.constant 0 : index
    %3 = vector.load %arg3[%c0, %c0_1] : memref<64x512xf32, #tpu.memory_space<vmem>>, vector<64x512xf32>
    %4 = arith.truncf %3 : vector<64x512xf32> to vector<64x512xbf16>
    %c0_2 = arith.constant 0 : index
    %c0_3 = arith.constant 0 : index
    %5 = vector.load %arg4[%c0_2, %c0_3] : memref<512x512xbf16, #tpu.memory_space<vmem>>, vector<512x512xbf16>
    %c0_4 = arith.constant 0 : index
    %c0_5 = arith.constant 0 : index
    %6 = vector.load %arg6[%c0_4, %c0_5] : memref<64x512xf32, #tpu.memory_space<vmem>>, vector<64x512xf32>
    %cst = arith.constant dense<0.000000e+00> : vector<64x512xf32>
    %7 = tpu.matmul %4, %5, %cst {dimension_numbers = #tpu.dot_dimension_numbers<[1], [0], [0], [1], [0, 0, 1, 1], [], []>} : vector<64x512xbf16>, vector<512x512xbf16>, vector<64x512xf32> -> vector<64x512xf32>
    %8 = arith.addf %6, %7 : vector<64x512xf32>
    %c0_6 = arith.constant 0 : index
    %c0_7 = arith.constant 0 : index
    %9 = vector.load %arg6[%c0_6, %c0_7] : memref<64x512xf32, #tpu.memory_space<vmem>>, vector<64x512xf32>
    tpu.vector_store %arg6[%c0_6, %c0_7], %8 {strides = array<i32>} : memref<64x512xf32, #tpu.memory_space<vmem>>, vector<64x512xf32>,
    %c0_i32_8 = arith.constant 0 : i32
    %10 = arith.cmpi eq, %arg2, %c0_i32_8 : i32
    %11 = arith.extui %10 : i1 to i32
    %c0_i32_9 = arith.constant 0 : i32
    %12 = arith.cmpi ne, %11, %c0_i32_9 : i32
    scf.if %12 {
      %c0_10 = arith.constant 0 : index
      %c0_11 = arith.constant 0 : index
      %13 = vector.load %arg6[%c0_10, %c0_11] : memref<64x512xf32, #tpu.memory_space<vmem>>, vector<64x512xf32>
      %14 = arith.truncf %13 : vector<64x512xf32> to vector<64x512xbf16>
      %c0_12 = arith.constant 0 : index
      %c0_13 = arith.constant 0 : index
      %15 = vector.load %arg5[%c0_12, %c0_13] : memref<64x512xbf16, #tpu.memory_space<vmem>>, vector<64x512xbf16>
      tpu.vector_store %arg5[%c0_12, %c0_13], %14 {strides = array<i32>} : memref<64x512xbf16, #tpu.memory_space<vmem>>, vector<64x512xbf16>,
    } else {
    }
    return
  }
  func.func @transform_0(%arg0: i32, %arg1: i32, %arg2: i32) -> (i32, i32) {
    %c0_i32 = arith.constant 0 : i32
    return %arg0, %arg2 : i32, i32
  }
  func.func @transform_1(%arg0: i32, %arg1: i32, %arg2: i32) -> (i32, i32) {
    %c0_i32 = arith.constant 0 : i32
    return %arg2, %arg1 : i32, i32
  }
  func.func @transform_2(%arg0: i32, %arg1: i32, %arg2: i32) -> (i32, i32) {
    %c0_i32 = arith.constant 0 : i32
    return %arg0, %arg1 : i32, i32
  }
}

</mosaic_0001>

<bundles_post_ra>
// kernel: tpu_custom_call.1
= control target key start
LH: loop header
LB: loop body
LE: loop exit
PB: predicated region body
PF: predicated region fallthrough
CT: control target
= control target key end

     0   :  { %7 = vsyncpa [#allocation4], 0  ;;  %s3306_s0 = inlined_call_operand.hbm [shape: f32[64,512], index: 0, kind: input, shape index: {}]   ;;  %s3307_s1 = inlined_call_operand.hbm [shape: bf16[512,1024], index: 1, kind: input, shape index: {}]   ;;  %s3308_s2 = inlined_call_operand.hbm [shape: bf16[64,1024], index: 2, kind: output, shape index: {}]  }
   0x1   :  { %8 = vsyncpa [#allocation7], 0 }
   0x2   :  { %10 = vsyncpa [#allocation7 + $0x1], 0 }
   0x3   :  { %11 = vsyncpa [#allocation5], 0 }
   0x4   :  { %13 = vsyncpa [#allocation5 + $0x1], 0  ;;  %s2741_s9 = smov 0   ;;  %s2743_s10 = smov 0  }
   0x5   :  { %s2745_s11 = smov 0   ;;  %s2747_s12 = smov 0  }
   0x6   :  { %s2749_s13 = smov 0   ;;  %s2751_s14 = smov 0  }
   0x7 LB: > { %s1831_s15 = sadd.s32 4294967295, %s2716_s14   ;;  %s1832_s16 = sadd.s32 4294967294, %s2716_s14   ;;  %s2716_s14 = sphi %s2751_s14, %s19_s14   ;;  %s2712_s13 = sphi %s2749_s13, %s3322_s13   ;;  %s2708_s12 = sphi %s2747_s12, %s3321_s12   ;;  %s2704_s11 = sphi %s2745_s11, %s3320_s11   ;;  %s2700_s10 = sphi %s2743_s10, %s3319_s10   ;;  %s2696_s9 = sphi %s2741_s9, %s3318_s9  }
   0x8   : > { %p88_p0 = scmp.ne.s32.totalorder %s2700_s10, %s2696_s9  ;;  %p2775_p1 = scmp.eq.s32.totalorder %s1831_s15, 0 }
   0x9   : > { %p2779_p2 = scmp.eq.s32.totalorder %s1831_s15, 1  ;;  %p120_p3 = scmp.eq.s32.totalorder %s1832_s16, 1 }
   0xa   : > { %p2785_p4 = por %p2775_p1, %p88_p0  ;;  %p1833_p5 = scmp.ge.s32.totalorder %s2716_s14, 1 }
   0xb   : > { %p2790_p6 = por %p120_p3, %p88_p0  ;;  %p127_p7 = scmp.lt.s32.totalorder %s2716_s14, 3 }
   0xc   : > { %s144_s23 = sshll.u32 %s3306_s0, 4  ;;  %s2718_s25 = smov [#allocation3]   ;;  %s145_s23 = int_to_ptr.hbm [resolvable:$true] %s144_s23 }
   0xd   : > { %p2798_p8 = pnand %p1833_p5, %p127_p7  ;;  %s146_s26 = sshll.u32 %s2718_s25, 4  ;;  %s147_s26 = int_to_ptr.vmem [resolvable:$true] %s146_s26 }
   0xe   : > { %p1835_p11 = scmp.ge.s32.totalorder %s2716_s14, 2  ;;  %s3309_s27 = smov 512  }
   0xf   : > { %p2498_p9 = pneg %p2798_p8  ;;  %s2720_s28 = smov 32  }
  0x10   : > { %s34_s29 = sadd.s32 1, %s2712_s13  ;;  %s75_s30 = sadd.s32 1, %s2704_s11 }
  0x11   : > { %p2499_p10 = pnand %p2498_p9, %p2775_p1  ;;  %p36_p12 = scmp.ge.s32.totalorder %s34_s29, 2 }
  0x12   : > { %p82_p13 = scmp.ne.s32.totalorder %s2704_s11, %s2700_s10  ;;  %p83_p0 = scmp.eq.s32.totalorder %s2716_s14, 0 }
  0x13   : > { %2501 = dma.hbm_to_vmem [thread:$0]  (!%p2499_p10), %s145_s23, 4096, %s147_s26, [#allocation4], %s3309_s27, %s3309_s27, %s2720_s28  }
  0x14   : > { %s3324_s29 = smov (%p36_p12, %s34_s29), 0  ;;  %p2816_p3 = por %p83_p0, %p82_p13 }
  0x15   : > { %p2822_p5 = por %p2779_p2, %p82_p13  ;;  %s71_s5 = ssub.s32 %s2712_s13, %s3324_s29 }
  0x16   : > { %p2511_p7 = scmp.lt.s32.totalorder %s2716_s14, 2  ;;  %p73_p9 = scmp.eq.s32.totalorder %s71_s5, 0 }
  0x17   : > { %s160_s6 = sand.u32 1, %s2704_s11   ;;  %s2360_s15 = sshll.u32 %s2712_s13, 4 }
  0x18   : > { %s1836_s7 = sshll.u32 %s160_s6, 10  ;;  %s172_s22 = scalar_lea.hbm %s3307_s1, %s2360_s15 }
  0x19   : > { %s2831_s8 = scalar_select %p73_p9, %s2704_s11, %s75_s30  }
  0x1a   : > { %s164_s23 = scalar_lea.vmem [#allocation6], %s1836_s7  ;;  %s173_s18 = sshll.u32 %s172_s22, 4  ;;  %s174_s18 = int_to_ptr.hbm [resolvable:$true] %s173_s18 }
  0x1b   : > { %s175_s25 = sshll.u32 %s164_s23, 4  ;;  %p2503_p2 = pnand %p2511_p7, %p2816_p3  ;;  %s176_s25 = int_to_ptr.vmem [resolvable:$true] %s175_s25 }
  0x1c   : > { %s161_s26 = scalar_lea.sflag [#allocation7], %s160_s6  ;;  %s2721_s28 = smov 256  }
  0x1d   : > { %s2722_s27 = smov 16   ;;  %s3317_s5 = smov 512  }
  0x1e   : > { %2505 = dma.hbm_to_vmem [thread:$0]  (!%p2503_p2), %s174_s18, 16384, %s176_s25, %s161_s26, %s3317_s5, %s2721_s28, %s2722_s27  }
  0x1f   : > { %187 = sbr.rel (%p2798_p8) target bundleno = 468 (0x1d4), region = 28 }
  0x24   : > { %2683 = dma.done.wait (%p2775_p1), [#allocation4], 4096  }
  0x25   : > { %2685 = vsyncadd (%p2775_p1), [#allocation4], 4294963200  ;;  %s2847_s30 = sand.u32 1, %s2700_s10  }
  0x26   : > { %s1841_s3 = sshll.u32 %s2847_s30, 10  ;;  %s195_s6 = scalar_lea.sflag [#allocation7], %s2847_s30 }
  0x27   : > { %s2851_s7 = scalar_lea.vmem [#allocation6], %s1841_s3 }
  0x28   : > { %2687 = dma.done.wait (%p2785_p4), %s195_s6, 16384  }
  0x29   : > { %2689 = vsyncadd (%p2785_p4), %s195_s6, 4294950912  ;;  %v1957_v0 = vld [vmem:[%s2851_s7 + $0xe0] sm:$0xf]  ;;  %v2391_v1 = vld [vmem:[%s2851_s7 + $0xec] sm:$0xf0]  ;;  %s1842_s17 = sshll.u32 %s2847_s30, 7 }
  0x2a   : > { %v2085_v2 = vld [vmem:[%s2851_s7 + $0x1e0] sm:$0xf]  ;;  %v1958_v3 = vor.u32 %v2391_v1, %v1957_v0  ;;  %v2423_v4 = vld [vmem:[%s2851_s7 + $0x1ec] sm:$0xf0]  ;;  %s3215_s19 = scalar_lea.vmem [#allocation8], %s1842_s17  ;;  %s2489_s24 = sshll.u32 %s2708_s12, 4 }
  0x2b   : > { %v2213_v5 = vld [vmem:[%s2851_s7 + $0x2e0] sm:$0xf]  ;;  %v2455_v6 = vld [vmem:[%s2851_s7 + $0x2ec] sm:$0xf0]  ;;  %v2086_v7 = vor.u32 %v2423_v4, %v2085_v2  ;;  %s1720_s16 = scalar_lea.hbm %s3308_s2, %s2489_s24  ;;  %s1721_s21 = sshll.u32 %s3215_s19, 4  ;;  %s1722_s21 = int_to_ptr.vmem [resolvable:$true] %s1721_s21 }
  0x2c   : > { %v2214_v8 = vor.u32 %v2455_v6, %v2213_v5  ;;  %v2341_v9 = vld [vmem:[%s2851_s7 + $0x3e0] sm:$0xf]  ;;  %v2487_v10 = vld [vmem:[%s2851_s7 + $0x3ec] sm:$0xf0]  ;;  %1110 = vmatpush.bf16.msra.mxu0 %v1958_v3  ;;  %s1723_s22 = sshll.u32 %s1720_s16, 4  ;;  %s1706_s12 = scalar_lea.sflag [#allocation5], %s2847_s30  ;;  %s1724_s22 = int_to_ptr.hbm [resolvable:$true] %s1723_s22 }
  0x2d   : > { %v1941_v11 = vld [vmem:[%s2851_s7 + $0xc0] sm:$0xf]  ;;  %v2342_v12 = vor.u32 %v2487_v10, %v2341_v9  ;;  %v2387_v13 = vld [vmem:[%s2851_s7 + $0xcc] sm:$0xf0]  ;;  %1139 = vmatpush.bf16.msra.mxu1 %v2086_v7  ;;  %s2644_s23 = sshra.s32 %s1724_s22, 4  ;;  %s2650_s28 = scalar_lea.hbm %s3308_s2, 256  ;;  %s2645_s23 = int_to_ptr.hbm [resolvable:$true] %s2644_s23 }
  0x2e   : > { %v2069_v14 = vld [vmem:[%s2851_s7 + $0x1c0] sm:$0xf]  ;;  %v2419_v15 = vld [vmem:[%s2851_s7 + $0x1cc] sm:$0xf0]  ;;  %1168 = vmatpush.bf16.msra.mxu2 %v2214_v8  ;;  %v1942_v16 = vor.u32 %v2387_v13, %v1941_v11  ;;  %s2646_s25 = scalar_lea.hbm %s2645_s23, 128  ;;  %p2651_p10 = scmp.lt.s32.totalorder %s2645_s23, %s3308_s2 }
  0x2f   : > { %v2070_v17 = vor.u32 %v2419_v15, %v2069_v14  ;;  %v2197_v18 = vld [vmem:[%s2851_s7 + $0x2c0] sm:$0xf]  ;;  %v2451_v19 = vld [vmem:[%s2851_s7 + $0x2cc] sm:$0xf0]  ;;  %1197 = vmatpush.bf16.msra.mxu3 %v2342_v12  ;;  %p2647_p1 = scmp.ne.s32.totalorder %s2645_s23, %s2646_s25  ;;  %p2652_p12 = scmp.lt.s32.totalorder %s2650_s28, %s2646_s25 }
  0x30   : > { %v2325_v20 = vld [vmem:[%s2851_s7 + $0x3c0] sm:$0xf]  ;;  %v2198_v21 = vor.u32 %v2451_v19, %v2197_v18  ;;  %v2483_v22 = vld [vmem:[%s2851_s7 + $0x3cc] sm:$0xf0]  ;;  %1111 = vmatpush.bf16.msra.mxu0 %v1942_v16 }
  0x31   : > { %v1925_v23 = vld [vmem:[%s2851_s7 + $0xa0] sm:$0xf]  ;;  %v2383_v24 = vld [vmem:[%s2851_s7 + $0xac] sm:$0xf0]  ;;  %v2326_v25 = vor.u32 %v2483_v22, %v2325_v20  ;;  %1140 = vmatpush.bf16.msra.mxu1 %v2070_v17  ;;  %p2648_p4 = pnand %p2647_p1, %p2822_p5  ;;  %p2653_p13 = por %p2652_p12, %p2651_p10 }
  0x32   : > { %v2053_v26 = vld [vmem:[%s2851_s7 + $0x1a0] sm:$0xf]  ;;  %v2415_v27 = vld [vmem:[%s2851_s7 + $0x1ac] sm:$0xf0]  ;;  %v1926_v29 = vor.u32 %v2383_v24, %v1925_v23  ;;  %1169 = vmatpush.bf16.msra.mxu2 %v2198_v21 }
  0x33   : > { %v2181_v28 = vld [vmem:[%s2851_s7 + $0x2a0] sm:$0xf]  ;;  %v2447_v30 = vld [vmem:[%s2851_s7 + $0x2ac] sm:$0xf0]  ;;  %v2054_v33 = vor.u32 %v2415_v27, %v2053_v26  ;;  %1198 = vmatpush.bf16.msra.mxu3 %v2326_v25  ;;  %p2649_p8 = pneg %p2648_p4 }
  0x34   : > { %v2309_v31 = vld [vmem:[%s2851_s7 + $0x3a0] sm:$0xf]  ;;  %v2479_v32 = vld [vmem:[%s2851_s7 + $0x3ac] sm:$0xf0]  ;;  %v2182_v34 = vor.u32 %v2447_v30, %v2181_v28  ;;  %1112 = vmatpush.bf16.msra.mxu0 %v1926_v29  ;;  %v263_v30 = vld [vmem:[#allocation3 + $0x8] sm:$0xff] }
  0x35   : > { %v1909_v35 = vld [vmem:[%s2851_s7 + $0x80] sm:$0xf]  ;;  %v2379_v36 = vld [vmem:[%s2851_s7 + $0x8c] sm:$0xf0]  ;;  %v2310_v38 = vor.u32 %v2479_v32, %v2309_v31  ;;  %1141 = vmatpush.bf16.msra.mxu1 %v2054_v33  ;;  %v267_v31 = vld [vmem:[#allocation3 + $0x28] sm:$0xff]  ;;  %p2654_p0 = pnand %p2653_p13, %p2649_p8 }
  0x36   : > { %v2037_v37 = vld [vmem:[%s2851_s7 + $0x180] sm:$0xf]  ;;  %v2411_v39 = vld [vmem:[%s2851_s7 + $0x18c] sm:$0xf0]  ;;  %v1910_v44 = vor.u32 %v2379_v36, %v1909_v35  ;;  %1170 = vmatpush.bf16.msra.mxu2 %v2182_v34  ;;  %v2453_v32 = vld [vmem:[%s2851_s7 + $0x2e4] sm:$0xf] }
  0x37   : > { %v2165_v40 = vld [vmem:[%s2851_s7 + $0x280] sm:$0xf]  ;;  %v2443_v41 = vld [vmem:[%s2851_s7 + $0x28c] sm:$0xf0]  ;;  %v2038_v45 = vor.u32 %v2411_v39, %v2037_v37  ;;  %1199 = vmatpush.bf16.msra.mxu3 %v2310_v38  ;;  %v2215_v33 = vld [vmem:[%s2851_s7 + $0x2f0] sm:$0xf0] }
  0x38   : > { %v2293_v42 = vld [vmem:[%s2851_s7 + $0x380] sm:$0xf]  ;;  %v2475_v43 = vld [vmem:[%s2851_s7 + $0x38c] sm:$0xf0]  ;;  %v2166_v46 = vor.u32 %v2443_v41, %v2165_v40  ;;  %1113 = vmatpush.bf16.msra.mxu0 %v1910_v44  ;;  %v2485_v36 = vld [vmem:[%s2851_s7 + $0x3e4] sm:$0xf]  ;;  %v2218_v44 = vor.u32 %v2453_v32, %v2215_v33 }
  0x39   : > { %v1893_v47 = vld [vmem:[%s2851_s7 + $0x60] sm:$0xf]  ;;  %v2375_v48 = vld [vmem:[%s2851_s7 + $0x6c] sm:$0xf0]  ;;  %v2294_v50 = vor.u32 %v2475_v43, %v2293_v42  ;;  %1142 = vmatpush.bf16.msra.mxu1 %v2038_v45  ;;  %v2343_v37 = vld [vmem:[%s2851_s7 + $0x3f0] sm:$0xf0] }
  0x3a   : > { %v2021_v49 = vld [vmem:[%s2851_s7 + $0x160] sm:$0xf]  ;;  %v2407_v51 = vld [vmem:[%s2851_s7 + $0x16c] sm:$0xf0]  ;;  %v1894_v56 = vor.u32 %v2375_v48, %v1893_v47  ;;  %1171 = vmatpush.bf16.msra.mxu2 %v2166_v46  ;;  %v265_v41 = vld [vmem:[#allocation3 + $0x18] sm:$0xff] }
  0x3b   : > { %v2149_v52 = vld [vmem:[%s2851_s7 + $0x260] sm:$0xf]  ;;  %v2439_v53 = vld [vmem:[%s2851_s7 + $0x26c] sm:$0xf0]  ;;  %v2022_v57 = vor.u32 %v2407_v51, %v2021_v49  ;;  %1200 = vmatpush.bf16.msra.mxu3 %v2294_v50  ;;  %v269_v42 = vld [vmem:[#allocation3 + $0x38] sm:$0xff]  ;;  %v2346_v49 = vor.u32 %v2485_v36, %v2343_v37 }
  0x3c   : > { %v2277_v54 = vld [vmem:[%s2851_s7 + $0x360] sm:$0xf]  ;;  %v2471_v55 = vld [vmem:[%s2851_s7 + $0x36c] sm:$0xf0]  ;;  %v2150_v58 = vor.u32 %v2439_v53, %v2149_v52  ;;  %1114 = vmatpush.bf16.msra.mxu0 %v1894_v56  ;;  %v2389_v45 = vld [vmem:[%s2851_s7 + $0xe4] sm:$0xf]  ;;  %v2933_v53 = vpack.c.bf16 %v267_v31, %v263_v30 }
  0x3d   : > { %v1877_v59 = vld [vmem:[%s2851_s7 + $0x40] sm:$0xf]  ;;  %v2371_v60 = vld [vmem:[%s2851_s7 + $0x4c] sm:$0xf0]  ;;  %v2278_v62 = vor.u32 %v2471_v55, %v2277_v54  ;;  %1143 = vmatpush.bf16.msra.mxu1 %v2022_v57  ;;  %v1959_v46 = vld [vmem:[%s2851_s7 + $0xf0] sm:$0xf0]  ;;  %v2939_v57 = vpack.c.bf16 %v269_v42, %v265_v41 }
  0x3e   : > { %v2005_v61 = vld [vmem:[%s2851_s7 + $0x140] sm:$0xf]  ;;  %v2403_v63 = vld [vmem:[%s2851_s7 + $0x14c] sm:$0xf0]  ;;  %v1878_v4 = vor.u32 %v2371_v60, %v1877_v59  ;;  %1172 = vmatpush.bf16.msra.mxu2 %v2150_v58  ;;  %v2421_v47 = vld [vmem:[%s2851_s7 + $0x1e4] sm:$0xf]  ;;  %v1962_v58 = vor.u32 %v2389_v45, %v1959_v46 }
  0x3f   : > { %v2133_v0 = vld [vmem:[%s2851_s7 + $0x240] sm:$0xf]  ;;  %v2435_v1 = vld [vmem:[%s2851_s7 + $0x24c] sm:$0xf0]  ;;  %v2006_v5 = vor.u32 %v2403_v63, %v2005_v61  ;;  %1201 = vmatpush.bf16.msra.mxu3 %v2278_v62  ;;  %v2087_v50 = vld [vmem:[%s2851_s7 + $0x1f0] sm:$0xf0] }
  0x40   : > { %v2261_v2 = vld [vmem:[%s2851_s7 + $0x340] sm:$0xf]  ;;  %v2467_v3 = vld [vmem:[%s2851_s7 + $0x34c] sm:$0xf0]  ;;  %v2134_v6 = vor.u32 %v2435_v1, %v2133_v0  ;;  %1115 = vmatpush.bf16.msra.mxu0 %v1878_v4  ;;  %v2449_v51 = vld [vmem:[%s2851_s7 + $0x2c4] sm:$0xf]  ;;  %v2090_v59 = vor.u32 %v2421_v47, %v2087_v50 }
  0x41   : > { %v1861_v7 = vld [vmem:[%s2851_s7 + $0x20] sm:$0xf]  ;;  %v2367_v8 = vld [vmem:[%s2851_s7 + $0x2c] sm:$0xf0]  ;;  %v2262_v10 = vor.u32 %v2467_v3, %v2261_v2  ;;  %1144 = vmatpush.bf16.msra.mxu1 %v2006_v5  ;;  %v2199_v52 = vld [vmem:[%s2851_s7 + $0x2d0] sm:$0xf0] }
  0x42   : > { %v1989_v9 = vld [vmem:[%s2851_s7 + $0x120] sm:$0xf]  ;;  %v2399_v11 = vld [vmem:[%s2851_s7 + $0x12c] sm:$0xf0]  ;;  %v1862_v17 = vor.u32 %v2367_v8, %v1861_v7  ;;  %1173 = vmatpush.bf16.msra.mxu2 %v2134_v6  ;;  %v2481_v55 = vld [vmem:[%s2851_s7 + $0x3c4] sm:$0xf]  ;;  %v2202_v60 = vor.u32 %v2449_v51, %v2199_v52 }
  0x43   : > { %v2117_v12 = vld [vmem:[%s2851_s7 + $0x220] sm:$0xf]  ;;  %v2431_v13 = vld [vmem:[%s2851_s7 + $0x22c] sm:$0xf0]  ;;  %v1990_v21 = vor.u32 %v2399_v11, %v1989_v9  ;;  %1202 = vmatpush.bf16.msra.mxu3 %v2262_v10  ;;  %v2327_v56 = vld [vmem:[%s2851_s7 + $0x3d0] sm:$0xf0] }
  0x44   : > { %v2245_v14 = vld [vmem:[%s2851_s7 + $0x320] sm:$0xf]  ;;  %v2463_v15 = vld [vmem:[%s2851_s7 + $0x32c] sm:$0xf0]  ;;  %v2118_v22 = vor.u32 %v2431_v13, %v2117_v12  ;;  %1116 = vmatpush.bf16.msra.mxu0 %v1862_v17  ;;  %v2385_v61 = vld [vmem:[%s2851_s7 + $0xc4] sm:$0xf]  ;;  %v2330_v0 = vor.u32 %v2481_v55, %v2327_v56 }
  0x45   : > { %v1845_v16 = vld [vmem:[%s2851_s7] sm:$0xf]  ;;  %v2363_v18 = vld [vmem:[%s2851_s7 + $0xc] sm:$0xf0]  ;;  %v2246_v26 = vor.u32 %v2463_v15, %v2245_v14  ;;  %1145 = vmatpush.bf16.msra.mxu1 %v1990_v21  ;;  %v1943_v62 = vld [vmem:[%s2851_s7 + $0xd0] sm:$0xf0] }
  0x46   : > { %v1973_v19 = vld [vmem:[%s2851_s7 + $0x100] sm:$0xf]  ;;  %v2395_v20 = vld [vmem:[%s2851_s7 + $0x10c] sm:$0xf0]  ;;  %v1846_v34 = vor.u32 %v2363_v18, %v1845_v16  ;;  %1174 = vmatpush.bf16.msra.mxu2 %v2118_v22  ;;  %v2417_v63 = vld [vmem:[%s2851_s7 + $0x1c4] sm:$0xf]  ;;  %v1946_v6 = vor.u32 %v2385_v61, %v1943_v62 }
  0x47   : > { %v2101_v23 = vld [vmem:[%s2851_s7 + $0x200] sm:$0xf]  ;;  %v2427_v24 = vld [vmem:[%s2851_s7 + $0x20c] sm:$0xf0]  ;;  %v1974_v38 = vor.u32 %v2395_v20, %v1973_v19  ;;  %1203 = vmatpush.bf16.msra.mxu3 %v2246_v26  ;;  %v2071_v1 = vld [vmem:[%s2851_s7 + $0x1d0] sm:$0xf0] }
  0x48   : > { %v2229_v25 = vld [vmem:[%s2851_s7 + $0x300] sm:$0xf]  ;;  %v2459_v27 = vld [vmem:[%s2851_s7 + $0x30c] sm:$0xf0]  ;;  %v2102_v39 = vor.u32 %v2427_v24, %v2101_v23  ;;  %1117 = vmatpush.bf16.msra.mxu0 %v1846_v34  ;;  %v2445_v2 = vld [vmem:[%s2851_s7 + $0x2a4] sm:$0xf]  ;;  %v2074_v7 = vor.u32 %v2417_v63, %v2071_v1 }
  0x49   : > { %v262_v28 = vld [vmem:[#allocation3] sm:$0xff]  ;;  %v264_v35 = vld [vmem:[#allocation3 + $0x10] sm:$0xff]  ;;  %v2230_v43 = vor.u32 %v2459_v27, %v2229_v25  ;;  %1146 = vmatpush.bf16.msra.mxu1 %v1974_v38  ;;  %v271_v26 = vld [vmem:[#allocation3 + $0x48] sm:$0xff] }
  0x4a   : > { %v266_v29 = vld [vmem:[#allocation3 + $0x20] sm:$0xff]  ;;  %v268_v40 = vld [vmem:[#allocation3 + $0x30] sm:$0xff]  ;;  %1175 = vmatpush.bf16.msra.mxu2 %v2102_v39  ;;  %v275_v27 = vld [vmem:[#allocation3 + $0x68] sm:$0xff] }
  0x4b   : > { %v2928_v48 = vpack.c.bf16 %v266_v29, %v262_v28  ;;  %v2935_v54 = vpack.c.bf16 %v268_v40, %v264_v35  ;;  %1204 = vmatpush.bf16.msra.mxu3 %v2230_v43  ;;  %v2183_v3 = vld [vmem:[%s2851_s7 + $0x2b0] sm:$0xf0]  ;;  %v2477_v4 = vld [vmem:[%s2851_s7 + $0x3a4] sm:$0xf]  ;;  %v273_v36 = vld [vmem:[#allocation3 + $0x58] sm:$0xff]  ;;  %v2977_v50 = vpack.c.bf16 %v275_v27, %v271_v26 }
  0x4c   : > { %1147 = vmatmul.bf16.vlgmr.msra.gmra.mxu1 %v2933_v53  ;;  %v2311_v5 = vld [vmem:[%s2851_s7 + $0x3b0] sm:$0xf0]  ;;  %1226 = vmatpush.bf16.msrb.mxu0 %v1962_v58  ;;  %v2186_v8 = vor.u32 %v2445_v2, %v2183_v3  ;;  %v2381_v9 = vld [vmem:[%s2851_s7 + $0xa4] sm:$0xf]  ;;  %v277_v37 = vld [vmem:[#allocation3 + $0x78] sm:$0xff] }
  0x4d   : > { %1118 = vmatmul.bf16.vlgmr.msra.gmra.mxu0 %v2928_v48  ;;  %1176 = vmatmul.bf16.vlgmr.msra.gmra.mxu2 %v2935_v54  ;;  %v1927_v10 = vld [vmem:[%s2851_s7 + $0xb0] sm:$0xf0]  ;;  %v2413_v11 = vld [vmem:[%s2851_s7 + $0x1a4] sm:$0xf]  ;;  %v2314_v12 = vor.u32 %v2477_v4, %v2311_v5  ;;  %v2983_v56 = vpack.c.bf16 %v277_v37, %v273_v36 }
  0x4e   : > { %1284 = vmatpush.bf16.msrb.mxu2 %v2218_v44  ;;  %1205 = vmatmul.bf16.vlgmr.msra.gmra.mxu3 %v2939_v57  ;;  %v2055_v13 = vld [vmem:[%s2851_s7 + $0x1b0] sm:$0xf0]  ;;  %v2441_v14 = vld [vmem:[%s2851_s7 + $0x284] sm:$0xf]  ;;  %v1930_v18 = vor.u32 %v2381_v9, %v1927_v10 }
  0x4f   : > { %1313 = vmatpush.bf16.msrb.mxu3 %v2346_v49  ;;  %1255 = vmatpush.bf16.msrb.mxu1 %v2090_v59  ;;  %v2167_v15 = vld [vmem:[%s2851_s7 + $0x290] sm:$0xf0]  ;;  %v2473_v16 = vld [vmem:[%s2851_s7 + $0x384] sm:$0xf]  ;;  %v2058_v21 = vor.u32 %v2413_v11, %v2055_v13 }
  0x50   : > { %v2295_v17 = vld [vmem:[%s2851_s7 + $0x390] sm:$0xf0]  ;;  %1227 = vmatpush.bf16.msrb.mxu0 %v1946_v6  ;;  %v270_v19 = vld [vmem:[#allocation3 + $0x40] sm:$0xff]  ;;  %v2170_v22 = vor.u32 %v2441_v14, %v2167_v15 }
  0x51   : > { %v274_v20 = vld [vmem:[#allocation3 + $0x60] sm:$0xff]  ;;  %v1911_v24 = vld [vmem:[%s2851_s7 + $0x90] sm:$0xf0]  ;;  %v2298_v28 = vor.u32 %v2473_v16, %v2295_v17 }
  0x52   : > { %1285 = vmatpush.bf16.msrb.mxu2 %v2202_v60  ;;  %v2377_v23 = vld [vmem:[%s2851_s7 + $0x84] sm:$0xf]  ;;  %v2039_v29 = vld [vmem:[%s2851_s7 + $0x190] sm:$0xf0]  ;;  %v2972_v44 = vpack.c.bf16 %v274_v20, %v270_v19 }
  0x53   : > { %1314 = vmatpush.bf16.msrb.mxu3 %v2330_v0  ;;  %1256 = vmatpush.bf16.msrb.mxu1 %v2074_v7  ;;  %v2409_v25 = vld [vmem:[%s2851_s7 + $0x184] sm:$0xf]  ;;  %v2151_v31 = vld [vmem:[%s2851_s7 + $0x270] sm:$0xf0]  ;;  %v1914_v38 = vor.u32 %v2377_v23, %v1911_v24 }
  0x54   : > { %v2437_v30 = vld [vmem:[%s2851_s7 + $0x264] sm:$0xf]  ;;  %v272_v32 = vld [vmem:[#allocation3 + $0x50] sm:$0xff]  ;;  %1228 = vmatpush.bf16.msrb.mxu0 %v1930_v18  ;;  %v2042_v39 = vor.u32 %v2409_v25, %v2039_v29  ;;  %v283_v29 = vld [vmem:[#allocation3 + $0xa8] sm:$0xff] }
  0x55   : > { %v2469_v33 = vld [vmem:[%s2851_s7 + $0x364] sm:$0xf]  ;;  %v2279_v34 = vld [vmem:[%s2851_s7 + $0x370] sm:$0xf0]  ;;  %v2154_v40 = vor.u32 %v2437_v30, %v2151_v31 }
  0x56   : > { %1286 = vmatpush.bf16.msrb.mxu2 %v2186_v8  ;;  %v276_v35 = vld [vmem:[#allocation3 + $0x70] sm:$0xff]  ;;  %v2373_v41 = vld [vmem:[%s2851_s7 + $0x64] sm:$0xf]  ;;  %v2282_v45 = vor.u32 %v2469_v33, %v2279_v34  ;;  %v281_v33 = vld [vmem:[#allocation3 + $0x98] sm:$0xff] }
  0x57   : > { %1315 = vmatpush.bf16.msrb.mxu3 %v2314_v12  ;;  %1257 = vmatpush.bf16.msrb.mxu1 %v2058_v21  ;;  %v1895_v42 = vld [vmem:[%s2851_s7 + $0x70] sm:$0xf0]  ;;  %v2405_v43 = vld [vmem:[%s2851_s7 + $0x164] sm:$0xf]  ;;  %v2979_v51 = vpack.c.bf16 %v276_v35, %v272_v32  ;;  %v285_v34 = vld [vmem:[#allocation3 + $0xb8] sm:$0xff] }
  0x58   : > { %v2023_v46 = vld [vmem:[%s2851_s7 + $0x170] sm:$0xf0]  ;;  %v2433_v47 = vld [vmem:[%s2851_s7 + $0x244] sm:$0xf]  ;;  %1229 = vmatpush.bf16.msrb.mxu0 %v1914_v38  ;;  %v1898_v58 = vor.u32 %v2373_v41, %v1895_v42  ;;  %v2456_v41 = vld [vmem:[%s2851_s7 + $0x2f4] sm:$0xf0] }
  0x59   : > { %v2135_v49 = vld [vmem:[%s2851_s7 + $0x250] sm:$0xf0]  ;;  %v2465_v52 = vld [vmem:[%s2851_s7 + $0x344] sm:$0xf]  ;;  %v2026_v59 = vor.u32 %v2405_v43, %v2023_v46  ;;  %v2349_v42 = vld [vmem:[%s2851_s7 + $0x3e8] sm:$0xf] }
  0x5a   : > { %1287 = vmatpush.bf16.msrb.mxu2 %v2170_v22  ;;  %v2263_v55 = vld [vmem:[%s2851_s7 + $0x350] sm:$0xf0]  ;;  %v2138_v60 = vor.u32 %v2433_v47, %v2135_v49  ;;  %v2369_v61 = vld [vmem:[%s2851_s7 + $0x44] sm:$0xf]  ;;  %v1965_v46 = vld [vmem:[%s2851_s7 + $0xe8] sm:$0xf] }
  0x5b   : > { %1316 = vmatpush.bf16.msrb.mxu3 %v2298_v28  ;;  %1258 = vmatpush.bf16.msrb.mxu1 %v2042_v39  ;;  %v1879_v62 = vld [vmem:[%s2851_s7 + $0x50] sm:$0xf0]  ;;  %v2266_v63 = vor.u32 %v2465_v52, %v2263_v55  ;;  %v2401_v0 = vld [vmem:[%s2851_s7 + $0x144] sm:$0xf]  ;;  %v279_v28 = vld [vmem:[#allocation3 + $0x88] sm:$0xff]  ;;  %v3015_v39 = vpack.c.bf16 %v285_v34, %v281_v33 }
  0x5c   : > { %v2007_v1 = vld [vmem:[%s2851_s7 + $0x150] sm:$0xf0]  ;;  %1152 = vmatmul.bf16.gmra.mxu1 %v2977_v50  ;;  %1230 = vmatpush.bf16.msrb.mxu0 %v1898_v58  ;;  %v1882_v2 = vor.u32 %v2369_v61, %v1879_v62  ;;  %v2429_v3 = vld [vmem:[%s2851_s7 + $0x224] sm:$0xf]  ;;  %v3011_v37 = vpack.c.bf16 %v283_v29, %v279_v28  ;;  %v2392_v47 = vld [vmem:[%s2851_s7 + $0xf4] sm:$0xf0] }
  0x5d   : > { %1123 = vmatmul.bf16.gmra.mxu0 %v2972_v44  ;;  %1181 = vmatmul.bf16.gmra.mxu2 %v2979_v51  ;;  %v2119_v4 = vld [vmem:[%s2851_s7 + $0x230] sm:$0xf0]  ;;  %v2461_v5 = vld [vmem:[%s2851_s7 + $0x324] sm:$0xf]  ;;  %v2010_v6 = vor.u32 %v2401_v0, %v2007_v1  ;;  %v1966_v52 = vor.u32 %v2392_v47, %v1965_v46  ;;  %v2093_v55 = vld [vmem:[%s2851_s7 + $0x1e8] sm:$0xf] }
  0x5e   : > { %1288 = vmatpush.bf16.msrb.mxu2 %v2154_v40  ;;  %1210 = vmatmul.bf16.gmra.mxu3 %v2983_v56  ;;  %v2122_v7 = vor.u32 %v2429_v3, %v2119_v4  ;;  %v2247_v8 = vld [vmem:[%s2851_s7 + $0x330] sm:$0xf0]  ;;  %v2365_v9 = vld [vmem:[%s2851_s7 + $0x24] sm:$0xf]  ;;  %v2221_v40 = vld [vmem:[%s2851_s7 + $0x2e8] sm:$0xf] }
  0x5f   : > { %1317 = vmatpush.bf16.msrb.mxu3 %v2282_v45  ;;  %1259 = vmatpush.bf16.msrb.mxu1 %v2026_v59  ;;  %v1863_v10 = vld [vmem:[%s2851_s7 + $0x30] sm:$0xf0]  ;;  %v2250_v11 = vor.u32 %v2461_v5, %v2247_v8  ;;  %v2397_v12 = vld [vmem:[%s2851_s7 + $0x124] sm:$0xf]  ;;  %v2222_v43 = vor.u32 %v2456_v41, %v2221_v40  ;;  %v2488_v45 = vld [vmem:[%s2851_s7 + $0x3f4] sm:$0xf0] }
  0x60   : > { %v1991_v13 = vld [vmem:[%s2851_s7 + $0x130] sm:$0xf0]  ;;  %v2425_v14 = vld [vmem:[%s2851_s7 + $0x204] sm:$0xf]  ;;  %1231 = vmatpush.bf16.msrb.mxu0 %v1882_v2  ;;  %v1866_v18 = vor.u32 %v2365_v9, %v1863_v10  ;;  %v2350_v49 = vor.u32 %v2488_v45, %v2349_v42  ;;  %v2424_v58 = vld [vmem:[%s2851_s7 + $0x1f4] sm:$0xf0] }
  0x61   : > { %v2103_v15 = vld [vmem:[%s2851_s7 + $0x210] sm:$0xf0]  ;;  %v2457_v16 = vld [vmem:[%s2851_s7 + $0x304] sm:$0xf]  ;;  %v1994_v19 = vor.u32 %v2397_v12, %v1991_v13  ;;  %v2205_v59 = vld [vmem:[%s2851_s7 + $0x2c8] sm:$0xf] }
  0x62   : > { %1289 = vmatpush.bf16.msrb.mxu2 %v2138_v60  ;;  %v2231_v17 = vld [vmem:[%s2851_s7 + $0x310] sm:$0xf0]  ;;  %v2106_v20 = vor.u32 %v2425_v14, %v2103_v15  ;;  %v2361_v21 = vld [vmem:[%s2851_s7 + $0x4] sm:$0xf]  ;;  %v2094_v60 = vor.u32 %v2424_v58, %v2093_v55  ;;  %v2452_v61 = vld [vmem:[%s2851_s7 + $0x2d4] sm:$0xf0] }
  0x63   : > { %1318 = vmatpush.bf16.msrb.mxu3 %v2266_v63  ;;  %1260 = vmatpush.bf16.msrb.mxu1 %v2010_v6  ;;  %v1847_v22 = vld [vmem:[%s2851_s7 + $0x10] sm:$0xf0]  ;;  %v2234_v23 = vor.u32 %v2457_v16, %v2231_v17  ;;  %v2393_v24 = vld [vmem:[%s2851_s7 + $0x104] sm:$0xf]  ;;  %v2333_v62 = vld [vmem:[%s2851_s7 + $0x3c8] sm:$0xf]  ;;  %v2206_v0 = vor.u32 %v2452_v61, %v2205_v59 }
  0x64   : > { %v1975_v25 = vld [vmem:[%s2851_s7 + $0x110] sm:$0xf0]  ;;  %v278_v26 = vld [vmem:[#allocation3 + $0x80] sm:$0xff]  ;;  %1232 = vmatpush.bf16.msrb.mxu0 %v1866_v18  ;;  %v1850_v32 = vor.u32 %v2361_v21, %v1847_v22  ;;  %v2484_v63 = vld [vmem:[%s2851_s7 + $0x3d4] sm:$0xf0] }
  0x65   : > { %v282_v27 = vld [vmem:[#allocation3 + $0xa0] sm:$0xff]  ;;  %v280_v30 = vld [vmem:[#allocation3 + $0x90] sm:$0xff]  ;;  %v1978_v35 = vor.u32 %v2393_v24, %v1975_v25  ;;  %v2334_v1 = vor.u32 %v2484_v63, %v2333_v62  ;;  %v1949_v2 = vld [vmem:[%s2851_s7 + $0xc8] sm:$0xf] }
  0x66   : > { %1290 = vmatpush.bf16.msrb.mxu2 %v2122_v7  ;;  %v284_v31 = vld [vmem:[#allocation3 + $0xb0] sm:$0xff]  ;;  %v3009_v36 = vpack.c.bf16 %v282_v27, %v278_v26  ;;  %v2388_v3 = vld [vmem:[%s2851_s7 + $0xd4] sm:$0xf0]  ;;  %v2077_v4 = vld [vmem:[%s2851_s7 + $0x1c8] sm:$0xf] }
  0x67   : > { %1319 = vmatpush.bf16.msrb.mxu3 %v2250_v11  ;;  %1261 = vmatpush.bf16.msrb.mxu1 %v1994_v19  ;;  %v3013_v38 = vpack.c.bf16 %v284_v31, %v280_v30  ;;  %v1950_v5 = vor.u32 %v2388_v3, %v1949_v2  ;;  %v2420_v6 = vld [vmem:[%s2851_s7 + $0x1d4] sm:$0xf0]  ;;  %v286_v8 = vld [vmem:[#allocation3 + $0xc0] sm:$0xff]  ;;  %v287_v10 = vld [vmem:[#allocation3 + $0xc8] sm:$0xff] }
  0x68   : > { %1233 = vmatpush.bf16.msrb.mxu0 %v1850_v32  ;;  %v2078_v7 = vor.u32 %v2420_v6, %v2077_v4  ;;  %v290_v9 = vld [vmem:[#allocation3 + $0xe0] sm:$0xff]  ;;  %v291_v11 = vld [vmem:[#allocation3 + $0xe8] sm:$0xff]  ;;  %v288_v12 = vld [vmem:[#allocation3 + $0xd0] sm:$0xff] }
  0x69   : > { %v292_v13 = vld [vmem:[#allocation3 + $0xf0] sm:$0xff]  ;;  %v289_v14 = vld [vmem:[#allocation3 + $0xd8] sm:$0xff]  ;;  %v3037_v16 = vpack.c.bf16 %v290_v9, %v286_v8  ;;  %v3039_v17 = vpack.c.bf16 %v291_v11, %v287_v10  ;;  %v2317_v22 = vld [vmem:[%s2851_s7 + $0x3a8] sm:$0xf] }
  0x6a   : > { %1291 = vmatpush.bf16.msrb.mxu2 %v2106_v20  ;;  %v293_v15 = vld [vmem:[#allocation3 + $0xf8] sm:$0xff]  ;;  %v3041_v18 = vpack.c.bf16 %v292_v13, %v288_v12  ;;  %v2189_v20 = vld [vmem:[%s2851_s7 + $0x2a8] sm:$0xf] }
  0x6b   : > { %1320 = vmatpush.bf16.msrb.mxu3 %v2234_v23  ;;  %1262 = vmatpush.bf16.msrb.mxu1 %v1978_v35  ;;  %v3043_v19 = vpack.c.bf16 %v293_v15, %v289_v14  ;;  %v2448_v21 = vld [vmem:[%s2851_s7 + $0x2b4] sm:$0xf0]  ;;  %v1933_v25 = vld [vmem:[%s2851_s7 + $0xa8] sm:$0xf] }
  0x6c   : > { %1157 = vmatmul.bf16.gmra.mxu1 %v3011_v37  ;;  %1342 = vmatpush.bf16.msra.mxu0 %v1966_v52  ;;  %v2190_v23 = vor.u32 %v2448_v21, %v2189_v20  ;;  %v2480_v24 = vld [vmem:[%s2851_s7 + $0x3b4] sm:$0xf0]  ;;  %v2061_v29 = vld [vmem:[%s2851_s7 + $0x1a8] sm:$0xf] }
  0x6d   : > { %1128 = vmatmul.bf16.gmra.mxu0 %v3009_v36  ;;  %1186 = vmatmul.bf16.gmra.mxu2 %v3013_v38  ;;  %v2384_v26 = vld [vmem:[%s2851_s7 + $0xb4] sm:$0xf0]  ;;  %v2318_v27 = vor.u32 %v2480_v24, %v2317_v22  ;;  %v2173_v31 = vld [vmem:[%s2851_s7 + $0x288] sm:$0xf] }
  0x6e   : > { %1215 = vmatmul.bf16.gmra.mxu3 %v3015_v39  ;;  %1400 = vmatpush.bf16.msra.mxu2 %v2222_v43  ;;  %v1934_v28 = vor.u32 %v2384_v26, %v1933_v25  ;;  %v2416_v30 = vld [vmem:[%s2851_s7 + $0x1b4] sm:$0xf0]  ;;  %v2301_v34 = vld [vmem:[%s2851_s7 + $0x388] sm:$0xf] }
  0x6f   : > { %1429 = vmatpush.bf16.msra.mxu3 %v2350_v49  ;;  %1371 = vmatpush.bf16.msra.mxu1 %v2094_v60  ;;  %v2062_v32 = vor.u32 %v2416_v30, %v2061_v29  ;;  %v2444_v33 = vld [vmem:[%s2851_s7 + $0x294] sm:$0xf0]  ;;  %v1917_v42 = vld [vmem:[%s2851_s7 + $0x88] sm:$0xf] }
  0x70   : > { %1343 = vmatpush.bf16.msra.mxu0 %v1950_v5  ;;  %v2476_v35 = vld [vmem:[%s2851_s7 + $0x394] sm:$0xf0]  ;;  %v2174_v40 = vor.u32 %v2444_v33, %v2173_v31  ;;  %v2045_v45 = vld [vmem:[%s2851_s7 + $0x188] sm:$0xf] }
  0x71   : > { %v2302_v41 = vor.u32 %v2476_v35, %v2301_v34  ;;  %v2380_v43 = vld [vmem:[%s2851_s7 + $0x94] sm:$0xf0]  ;;  %v2157_v52 = vld [vmem:[%s2851_s7 + $0x268] sm:$0xf] }
  0x72   : > { %1401 = vmatpush.bf16.msra.mxu2 %v2206_v0  ;;  %v1918_v46 = vor.u32 %v2380_v43, %v1917_v42  ;;  %v2412_v47 = vld [vmem:[%s2851_s7 + $0x194] sm:$0xf0]  ;;  %v2285_v58 = vld [vmem:[%s2851_s7 + $0x368] sm:$0xf] }
  0x73   : > { %1430 = vmatpush.bf16.msra.mxu3 %v2334_v1  ;;  %1372 = vmatpush.bf16.msra.mxu1 %v2078_v7  ;;  %v2046_v49 = vor.u32 %v2412_v47, %v2045_v45  ;;  %v2440_v55 = vld [vmem:[%s2851_s7 + $0x274] sm:$0xf0]  ;;  %v1901_v61 = vld [vmem:[%s2851_s7 + $0x68] sm:$0xf] }
  0x74   : > { %1344 = vmatpush.bf16.msra.mxu0 %v1934_v28  ;;  %v2158_v59 = vor.u32 %v2440_v55, %v2157_v52  ;;  %v2472_v60 = vld [vmem:[%s2851_s7 + $0x374] sm:$0xf0]  ;;  %v2029_v1 = vld [vmem:[%s2851_s7 + $0x168] sm:$0xf]  ;;  %v2454_v52 = vld [vmem:[%s2851_s7 + $0x2ec] sm:$0xf] }
  0x75   : > { %v2376_v62 = vld [vmem:[%s2851_s7 + $0x74] sm:$0xf0]  ;;  %v2286_v63 = vor.u32 %v2472_v60, %v2285_v58  ;;  %v2141_v3 = vld [vmem:[%s2851_s7 + $0x248] sm:$0xf]  ;;  %v2223_v55 = vld [vmem:[%s2851_s7 + $0x2f8] sm:$0xf0] }
  0x76   : > { %1402 = vmatpush.bf16.msra.mxu2 %v2190_v23  ;;  %v1902_v0 = vor.u32 %v2376_v62, %v1901_v61  ;;  %v2408_v2 = vld [vmem:[%s2851_s7 + $0x174] sm:$0xf0]  ;;  %v2269_v6 = vld [vmem:[%s2851_s7 + $0x348] sm:$0xf]  ;;  %v2486_v58 = vld [vmem:[%s2851_s7 + $0x3ec] sm:$0xf] }
  0x77   : > { %1431 = vmatpush.bf16.msra.mxu3 %v2318_v27  ;;  %1373 = vmatpush.bf16.msra.mxu1 %v2062_v32  ;;  %v2030_v4 = vor.u32 %v2408_v2, %v2029_v1  ;;  %v2436_v5 = vld [vmem:[%s2851_s7 + $0x254] sm:$0xf0]  ;;  %v1885_v10 = vld [vmem:[%s2851_s7 + $0x48] sm:$0xf]  ;;  %v2351_v60 = vld [vmem:[%s2851_s7 + $0x3f8] sm:$0xf0] }
  0x78   : > { %1345 = vmatpush.bf16.msra.mxu0 %v1918_v46  ;;  %v2468_v7 = vld [vmem:[%s2851_s7 + $0x354] sm:$0xf0]  ;;  %v2142_v8 = vor.u32 %v2436_v5, %v2141_v3  ;;  %v2013_v12 = vld [vmem:[%s2851_s7 + $0x148] sm:$0xf]  ;;  %v2354_v61 = vor.u32 %v2486_v58, %v2351_v60  ;;  %v2390_v62 = vld [vmem:[%s2851_s7 + $0xec] sm:$0xf] }
  0x79   : > { %v2270_v9 = vor.u32 %v2468_v7, %v2269_v6  ;;  %v2372_v11 = vld [vmem:[%s2851_s7 + $0x54] sm:$0xf0]  ;;  %v2125_v20 = vld [vmem:[%s2851_s7 + $0x228] sm:$0xf]  ;;  %v2095_v2 = vld [vmem:[%s2851_s7 + $0x1f8] sm:$0xf0] }
  0x7a   : > { %1403 = vmatpush.bf16.msra.mxu2 %v2174_v40  ;;  %v1886_v13 = vor.u32 %v2372_v11, %v1885_v10  ;;  %v2404_v14 = vld [vmem:[%s2851_s7 + $0x154] sm:$0xf0]  ;;  %v2253_v22 = vld [vmem:[%s2851_s7 + $0x328] sm:$0xf]  ;;  %v2450_v3 = vld [vmem:[%s2851_s7 + $0x2cc] sm:$0xf] }
  0x7b   : > { %1432 = vmatpush.bf16.msra.mxu3 %v2302_v41  ;;  %1374 = vmatpush.bf16.msra.mxu1 %v2046_v49  ;;  %v2014_v15 = vor.u32 %v2404_v14, %v2013_v12  ;;  %v2432_v21 = vld [vmem:[%s2851_s7 + $0x234] sm:$0xf0]  ;;  %v1869_v25 = vld [vmem:[%s2851_s7 + $0x28] sm:$0xf]  ;;  %v2482_v7 = vld [vmem:[%s2851_s7 + $0x3cc] sm:$0xf] }
  0x7c   : > { %1162 = vmatmul.bf16.gmra.mxu1 %v3039_v17  ;;  %1346 = vmatpush.bf16.msra.mxu0 %v1902_v0  ;;  %v2126_v23 = vor.u32 %v2432_v21, %v2125_v20  ;;  %v2464_v24 = vld [vmem:[%s2851_s7 + $0x334] sm:$0xf0]  ;;  %v1997_v29 = vld [vmem:[%s2851_s7 + $0x128] sm:$0xf]  ;;  %v2422_v0 = vld [vmem:[%s2851_s7 + $0x1ec] sm:$0xf] }
  0x7d   : > { %1133 = vmatmul.bf16.gmra.mxu0 %v3037_v16  ;;  %1191 = vmatmul.bf16.gmra.mxu2 %v3041_v18  ;;  %v2368_v26 = vld [vmem:[%s2851_s7 + $0x34] sm:$0xf0]  ;;  %v2254_v27 = vor.u32 %v2464_v24, %v2253_v22  ;;  %v2109_v31 = vld [vmem:[%s2851_s7 + $0x208] sm:$0xf]  ;;  %v2098_v5 = vor.u32 %v2422_v0, %v2095_v2  ;;  %v2386_v10 = vld [vmem:[%s2851_s7 + $0xcc] sm:$0xf] }
  0x7e   : > { %1220 = vmatmul.bf16.gmra.mxu3 %v3043_v19  ;;  %1404 = vmatpush.bf16.msra.mxu2 %v2158_v59  ;;  %v1870_v28 = vor.u32 %v2368_v26, %v1869_v25  ;;  %v2400_v30 = vld [vmem:[%s2851_s7 + $0x134] sm:$0xf0]  ;;  %v2237_v34 = vld [vmem:[%s2851_s7 + $0x308] sm:$0xf]  ;;  %v2226_v59 = vor.u32 %v2454_v52, %v2223_v55  ;;  %v1951_v11 = vld [vmem:[%s2851_s7 + $0xd8] sm:$0xf0] }
  0x7f   : > { %1433 = vmatpush.bf16.msra.mxu3 %v2286_v63  ;;  %1375 = vmatpush.bf16.msra.mxu1 %v2030_v4  ;;  %v1998_v32 = vor.u32 %v2400_v30, %v1997_v29  ;;  %v2428_v33 = vld [vmem:[%s2851_s7 + $0x214] sm:$0xf0]  ;;  %v1853_v42 = vld [vmem:[%s2851_s7 + $0x8] sm:$0xf]  ;;  %v1967_v63 = vld [vmem:[%s2851_s7 + $0xf8] sm:$0xf0] }
  0x80   : > { %1347 = vmatpush.bf16.msra.mxu0 %v1886_v13  ;;  %v2460_v35 = vld [vmem:[%s2851_s7 + $0x314] sm:$0xf0]  ;;  %v2110_v40 = vor.u32 %v2428_v33, %v2109_v31  ;;  %v1981_v45 = vld [vmem:[%s2851_s7 + $0x108] sm:$0xf]  ;;  %v1970_v1 = vor.u32 %v2390_v62, %v1967_v63  ;;  %v2207_v4 = vld [vmem:[%s2851_s7 + $0x2d8] sm:$0xf0]  ;;  %v1954_v13 = vor.u32 %v2386_v10, %v1951_v11 }
  0x81   : > { %v2238_v41 = vor.u32 %v2460_v35, %v2237_v34  ;;  %v2364_v43 = vld [vmem:[%s2851_s7 + $0x14] sm:$0xf0]  ;;  %v2210_v6 = vor.u32 %v2450_v3, %v2207_v4  ;;  %v2418_v12 = vld [vmem:[%s2851_s7 + $0x1cc] sm:$0xf]  ;;  %v2079_v14 = vld [vmem:[%s2851_s7 + $0x1d8] sm:$0xf0] }
  0x82   : > { %1405 = vmatpush.bf16.msra.mxu2 %v2142_v8  ;;  %v1854_v46 = vor.u32 %v2364_v43, %v1853_v42  ;;  %v2396_v47 = vld [vmem:[%s2851_s7 + $0x114] sm:$0xf0]  ;;  %v2335_v8 = vld [vmem:[%s2851_s7 + $0x3d8] sm:$0xf0]  ;;  %v2446_v20 = vld [vmem:[%s2851_s7 + $0x2ac] sm:$0xf] }
  0x83   : > { %1434 = vmatpush.bf16.msra.mxu3 %v2270_v9  ;;  %1376 = vmatpush.bf16.msra.mxu1 %v2014_v15  ;;  %v1982_v49 = vor.u32 %v2396_v47, %v1981_v45  ;;  %v2338_v9 = vor.u32 %v2482_v7, %v2335_v8  ;;  %v2082_v15 = vor.u32 %v2418_v12, %v2079_v14  ;;  %v2191_v21 = vld [vmem:[%s2851_s7 + $0x2b8] sm:$0xf0]  ;;  %v2478_v22 = vld [vmem:[%s2851_s7 + $0x3ac] sm:$0xf] }
  0x84   : > { %1348 = vmatpush.bf16.msra.mxu0 %v1870_v28  ;;  %v2319_v24 = vld [vmem:[%s2851_s7 + $0x3b8] sm:$0xf0]  ;;  %v2382_v26 = vld [vmem:[%s2851_s7 + $0xac] sm:$0xf] }
  0x85   : > { %v2322_v25 = vor.u32 %v2478_v22, %v2319_v24  ;;  %v2414_v28 = vld [vmem:[%s2851_s7 + $0x1ac] sm:$0xf]  ;;  %v2063_v30 = vld [vmem:[%s2851_s7 + $0x1b8] sm:$0xf0] }
  0x86   : > { %1406 = vmatpush.bf16.msra.mxu2 %v2126_v23  ;;  %v2194_v23 = vor.u32 %v2446_v20, %v2191_v21  ;;  %v2442_v31 = vld [vmem:[%s2851_s7 + $0x28c] sm:$0xf]  ;;  %v2066_v33 = vor.u32 %v2414_v28, %v2063_v30  ;;  %v1919_v47 = vld [vmem:[%s2851_s7 + $0x98] sm:$0xf0] }
  0x87   : > { %1435 = vmatpush.bf16.msra.mxu3 %v2254_v27  ;;  %1377 = vmatpush.bf16.msra.mxu1 %v1998_v32  ;;  %v1935_v27 = vld [vmem:[%s2851_s7 + $0xb8] sm:$0xf0]  ;;  %v2474_v35 = vld [vmem:[%s2851_s7 + $0x38c] sm:$0xf] }
  0x88   : > { %1349 = vmatpush.bf16.msra.mxu0 %v1854_v46  ;;  %v1938_v29 = vor.u32 %v2382_v26, %v1935_v27  ;;  %v2175_v32 = vld [vmem:[%s2851_s7 + $0x298] sm:$0xf0]  ;;  %v2378_v46 = vld [vmem:[%s2851_s7 + $0x8c] sm:$0xf] }
  0x89   : > { %v2178_v34 = vor.u32 %v2442_v31, %v2175_v32  ;;  %v1922_v52 = vor.u32 %v2378_v46, %v1919_v47  ;;  %v2047_v55 = vld [vmem:[%s2851_s7 + $0x198] sm:$0xf0]  ;;  %v2374_v8 = vld [vmem:[%s2851_s7 + $0x6c] sm:$0xf] }
  0x8a   : > { %1407 = vmatpush.bf16.msra.mxu2 %v2110_v40  ;;  %v2303_v40 = vld [vmem:[%s2851_s7 + $0x398] sm:$0xf0]  ;;  %v2406_v10 = vld [vmem:[%s2851_s7 + $0x16c] sm:$0xf] }
  0x8b   : > { %1436 = vmatpush.bf16.msra.mxu3 %v2238_v41  ;;  %1378 = vmatpush.bf16.msra.mxu1 %v1982_v49  ;;  %v2306_v41 = vor.u32 %v2474_v35, %v2303_v40  ;;  %v2410_v49 = vld [vmem:[%s2851_s7 + $0x18c] sm:$0xf]  ;;  %v2159_v60 = vld [vmem:[%s2851_s7 + $0x278] sm:$0xf0] }
  0x8c   : > { %1263 = vmatmul.bf16.vlgmr.msrb.gmra.mxu1 %v2933_v53  ;;  %v2050_v58 = vor.u32 %v2410_v49, %v2047_v55  ;;  %v2287_v63 = vld [vmem:[%s2851_s7 + $0x378] sm:$0xf0]  ;;  %v2466_v21 = vld [vmem:[%s2851_s7 + $0x34c] sm:$0xf] }
  0x8d   : > { %1234 = vmatmul.bf16.vlgmr.msrb.gmra.mxu0 %v2928_v48  ;;  %1292 = vmatmul.bf16.vlgmr.msrb.gmra.mxu2 %v2935_v54  ;;  %v2031_v12 = vld [vmem:[%s2851_s7 + $0x178] sm:$0xf0]  ;;  %v2370_v31 = vld [vmem:[%s2851_s7 + $0x4c] sm:$0xf] }
  0x8e   : > { %1321 = vmatmul.bf16.vlgmr.msrb.gmra.mxu3 %v2939_v57  ;;  %1516 = vmatpush.bf16.msrb.mxu2 %v2226_v59  ;;  %v2438_v59 = vld [vmem:[%s2851_s7 + $0x26c] sm:$0xf]  ;;  %v2143_v14 = vld [vmem:[%s2851_s7 + $0x258] sm:$0xf0] }
  0x8f   : > { %1545 = vmatpush.bf16.msrb.mxu3 %v2354_v61  ;;  %1458 = vmatpush.bf16.msrb.mxu0 %v1970_v1  ;;  %v2470_v61 = vld [vmem:[%s2851_s7 + $0x36c] sm:$0xf]  ;;  %v2162_v62 = vor.u32 %v2438_v59, %v2159_v60  ;;  %v2271_v22 = vld [vmem:[%s2851_s7 + $0x358] sm:$0xf0] }
  0x90   : > { %1487 = vmatpush.bf16.msrb.mxu1 %v2098_v5  ;;  %v2290_v1 = vor.u32 %v2470_v61, %v2287_v63  ;;  %v1887_v32 = vld [vmem:[%s2851_s7 + $0x58] sm:$0xf0] }
  0x91   : > { %v2015_v35 = vld [vmem:[%s2851_s7 + $0x158] sm:$0xf0] }
  0x92   : > { %1517 = vmatpush.bf16.msrb.mxu2 %v2210_v6  ;;  %v2255_v46 = vld [vmem:[%s2851_s7 + $0x338] sm:$0xf0] }
  0x93   : > { %1546 = vmatpush.bf16.msrb.mxu3 %v2338_v9  ;;  %1459 = vmatpush.bf16.msrb.mxu0 %v1954_v13  ;;  %v1903_v9 = vld [vmem:[%s2851_s7 + $0x78] sm:$0xf0]  ;;  %v2434_v13 = vld [vmem:[%s2851_s7 + $0x24c] sm:$0xf] }
  0x94   : > { %1488 = vmatpush.bf16.msrb.mxu1 %v2082_v15  ;;  %v1906_v11 = vor.u32 %v2374_v8, %v1903_v9  ;;  %v2034_v15 = vor.u32 %v2406_v10, %v2031_v12  ;;  %v2146_v20 = vor.u32 %v2434_v13, %v2143_v14  ;;  %v1871_v63 = vld [vmem:[%s2851_s7 + $0x38] sm:$0xf0]  ;;  %v2458_v8 = vld [vmem:[%s2851_s7 + $0x30c] sm:$0xf] }
  0x95   : > { %v2239_v9 = vld [vmem:[%s2851_s7 + $0x318] sm:$0xf0]  ;;  %v2362_v12 = vld [vmem:[%s2851_s7 + $0xc] sm:$0xf] }
  0x96   : > { %1518 = vmatpush.bf16.msrb.mxu2 %v2194_v23  ;;  %v2274_v23 = vor.u32 %v2466_v21, %v2271_v22  ;;  %v2242_v10 = vor.u32 %v2458_v8, %v2239_v9  ;;  %v1855_v13 = vld [vmem:[%s2851_s7 + $0x18] sm:$0xf0]  ;;  %v2394_v14 = vld [vmem:[%s2851_s7 + $0x10c] sm:$0xf] }
  0x97   : > { %1547 = vmatpush.bf16.msrb.mxu3 %v2322_v25  ;;  %1460 = vmatpush.bf16.msrb.mxu0 %v1938_v29  ;;  %v1858_v22 = vor.u32 %v2362_v12, %v1855_v13 }
  0x98   : > { %1489 = vmatpush.bf16.msrb.mxu1 %v2066_v33  ;;  %v2402_v33 = vld [vmem:[%s2851_s7 + $0x14c] sm:$0xf] }
  0x99   : > { %v2018_v40 = vor.u32 %v2402_v33, %v2015_v35 }
  0x9a   : > { %1519 = vmatpush.bf16.msrb.mxu2 %v2178_v34  ;;  %v1890_v34 = vor.u32 %v2370_v31, %v1887_v32 }
  0x9b   : > { %1548 = vmatpush.bf16.msrb.mxu3 %v2306_v41  ;;  %1461 = vmatpush.bf16.msrb.mxu0 %v1922_v52  ;;  %v2430_v41 = vld [vmem:[%s2851_s7 + $0x22c] sm:$0xf] }
  0x9c   : > { %1268 = vmatmul.bf16.gmra.mxu1 %v2977_v50 }
  0x9d   : > { %1239 = vmatmul.bf16.gmra.mxu0 %v2972_v44  ;;  %1297 = vmatmul.bf16.gmra.mxu2 %v2979_v51 }
  0x9e   : > { %1326 = vmatmul.bf16.gmra.mxu3 %v2983_v56  ;;  %1490 = vmatpush.bf16.msrb.mxu1 %v2050_v58 }
  0x9f   : > { %1520 = vmatpush.bf16.msrb.mxu2 %v2162_v62  ;;  %1549 = vmatpush.bf16.msrb.mxu3 %v2290_v1  ;;  %v2366_v62 = vld [vmem:[%s2851_s7 + $0x2c] sm:$0xf] }
  0xa0   : > { %1462 = vmatpush.bf16.msrb.mxu0 %v1906_v11  ;;  %v1874_v1 = vor.u32 %v2366_v62, %v1871_v63 }
  0xa2   : > { %1491 = vmatpush.bf16.msrb.mxu1 %v2034_v15 }
  0xa3   : > { %1521 = vmatpush.bf16.msrb.mxu2 %v2146_v20  ;;  %1550 = vmatpush.bf16.msrb.mxu3 %v2274_v23  ;;  %v1983_v23 = vld [vmem:[%s2851_s7 + $0x118] sm:$0xf0] }
  0xa4   : > { %1463 = vmatpush.bf16.msrb.mxu0 %v1890_v34 }
  0xa6   : > { %1492 = vmatpush.bf16.msrb.mxu1 %v2018_v40 }
  0xa8   : > { %1464 = vmatpush.bf16.msrb.mxu0 %v1874_v1 }
  0xac   : > { %1273 = vmatmul.bf16.gmra.mxu1 %v3011_v37  ;;  %1465 = vmatpush.bf16.msrb.mxu0 %v1858_v22 }
  0xad   : > { %1244 = vmatmul.bf16.gmra.mxu0 %v3009_v36  ;;  %1302 = vmatmul.bf16.gmra.mxu2 %v3013_v38 }
  0xae   : > { %1331 = vmatmul.bf16.gmra.mxu3 %v3015_v39 }
  0xbc   : > { %1278 = vmatmul.bf16.gmra.mxu1 %v3039_v17 }
  0xbd   : > { %1249 = vmatmul.bf16.gmra.mxu0 %v3037_v16  ;;  %1307 = vmatmul.bf16.gmra.mxu2 %v3041_v18 }
  0xbe   : > { %1336 = vmatmul.bf16.gmra.mxu3 %v3043_v19 }
  0xc9   : > { %v1148_v43 = vpop.f32.mrf.mxu1 }
  0xca   : > { %v1119_v42 = vpop.f32.mrf.mxu0 }
  0xcb   : > { %v1149_v45 = vadd.f32 %v1148_v43, %v1119_v42  ;;  %v2127_v42 = vld [vmem:[%s2851_s7 + $0x238] sm:$0xf0]  ;;  %v2462_v43 = vld [vmem:[%s2851_s7 + $0x32c] sm:$0xf] }
  0xcc   : > { %1379 = vmatmul.bf16.vlgmr.msra.gmra.mxu1 %v2933_v53  ;;  %v2258_v49 = vor.u32 %v2462_v43, %v2255_v46 }
  0xcd   : > { %1350 = vmatmul.bf16.vlgmr.msra.gmra.mxu0 %v2928_v48  ;;  %1408 = vmatmul.bf16.vlgmr.msra.gmra.mxu2 %v2935_v54 }
  0xce   : > { %1437 = vmatmul.bf16.vlgmr.msra.gmra.mxu3 %v2939_v57 }
  0xcf   : > { %1551 = vmatpush.bf16.msrb.mxu3 %v2258_v49 }
  0xd0   : > { %v1177_v0 = vpop.f32.mrf.mxu2 }
  0xd1   : > { %v1178_v2 = vadd.f32 %v1177_v0, %v1149_v45  ;;  %v1206_v3 = vpop.f32.mrf.mxu3  ;;  %v1150_v5 = vpop.f32.mrf.mxu1  ;;  %v2130_v45 = vor.u32 %v2430_v41, %v2127_v42  ;;  %v2398_v0 = vld [vmem:[%s2851_s7 + $0x12c] sm:$0xf] }
  0xd2   : > { %v1121_v4 = vpop.f32.mrf.mxu0 }
  0xd3   : > { %v3153_v6 = vadd.f32 %v1206_v3, %v1178_v2  ;;  %v1151_v7 = vadd.f32 %v1150_v5, %v1121_v4  ;;  %1522 = vmatpush.bf16.msrb.mxu2 %v2130_v45  ;;  %v1999_v2 = vld [vmem:[%s2851_s7 + $0x138] sm:$0xf0]  ;;  %v2426_v3 = vld [vmem:[%s2851_s7 + $0x20c] sm:$0xf]  ;;  %1552 = vmatpush.bf16.msrb.mxu3 %v2242_v10 }
  0xd4   : > { %v2111_v4 = vld [vmem:[%s2851_s7 + $0x218] sm:$0xf0]  ;;  %v2002_v5 = vor.u32 %v2398_v0, %v1999_v2 }
  0xd6   : > { %1493 = vmatpush.bf16.msrb.mxu1 %v2002_v5 }
  0xd8   : > { %v1179_v24 = vpop.f32.mrf.mxu2 }
  0xd9   : > { %v1180_v25 = vadd.f32 %v1179_v24, %v1151_v7  ;;  %v1208_v26 = vpop.f32.mrf.mxu3  ;;  %v1153_v28 = vpop.f32.mrf.mxu1  ;;  %v2114_v7 = vor.u32 %v2426_v3, %v2111_v4 }
  0xda   : > { %v1124_v27 = vpop.f32.mrf.mxu0 }
  0xdb   : > { %v3163_v29 = vadd.f32 %v1208_v26, %v1180_v25  ;;  %v1154_v30 = vadd.f32 %v1153_v28, %v1124_v27  ;;  %1523 = vmatpush.bf16.msrb.mxu2 %v2114_v7  ;;  %v1986_v25 = vor.u32 %v2394_v14, %v1983_v23 }
  0xdc   : > { %1384 = vmatmul.bf16.gmra.mxu1 %v2977_v50 }
  0xdd   : > { %1355 = vmatmul.bf16.gmra.mxu0 %v2972_v44  ;;  %1413 = vmatmul.bf16.gmra.mxu2 %v2979_v51 }
  0xde   : > { %1442 = vmatmul.bf16.gmra.mxu3 %v2983_v56  ;;  %1494 = vmatpush.bf16.msrb.mxu1 %v1986_v25 }
  0xe0   : > { %v1182_v47 = vpop.f32.mrf.mxu2 }
  0xe1   : > { %v1183_v52 = vadd.f32 %v1182_v47, %v1154_v30  ;;  %v1211_v55 = vpop.f32.mrf.mxu3  ;;  %v1155_v59 = vpop.f32.mrf.mxu1 }
  0xe2   : > { %v1126_v58 = vpop.f32.mrf.mxu0 }
  0xe3   : > { %v3177_v60 = vadd.f32 %v1211_v55, %v1183_v52  ;;  %v1156_v61 = vadd.f32 %v1155_v59, %v1126_v58 }
  0xe8   : > { %v1184_v11 = vpop.f32.mrf.mxu2 }
  0xe9   : > { %v1185_v15 = vadd.f32 %v1184_v11, %v1156_v61  ;;  %v1213_v20 = vpop.f32.mrf.mxu3  ;;  %v1158_v24 = vpop.f32.mrf.mxu1 }
  0xea   : > { %v1129_v21 = vpop.f32.mrf.mxu0 }
  0xeb   : > { %v3191_v26 = vadd.f32 %v1213_v20, %v1185_v15  ;;  %v1159_v27 = vadd.f32 %v1158_v24, %v1129_v21 }
  0xec   : > { %1389 = vmatmul.bf16.gmra.mxu1 %v3011_v37 }
  0xed   : > { %1360 = vmatmul.bf16.gmra.mxu0 %v3009_v36  ;;  %1418 = vmatmul.bf16.gmra.mxu2 %v3013_v38 }
  0xee   : > { %1447 = vmatmul.bf16.gmra.mxu3 %v3015_v39 }
  0xf0   : > { %v1187_v28 = vpop.f32.mrf.mxu2 }
  0xf1   : > { %v1188_v30 = vadd.f32 %v1187_v28, %v1159_v27  ;;  %v1216_v31 = vpop.f32.mrf.mxu3  ;;  %v1160_v33 = vpop.f32.mrf.mxu1 }
  0xf2   : > { %v1131_v32 = vpop.f32.mrf.mxu0 }
  0xf3   : > { %v3197_v34 = vadd.f32 %v1216_v31, %v1188_v30  ;;  %v1161_v35 = vadd.f32 %v1160_v33, %v1131_v32 }
  0xf8   : > { %v1189_v40 = vpop.f32.mrf.mxu2 }
  0xf9   : > { %v1190_v41 = vadd.f32 %v1189_v40, %v1161_v35  ;;  %v1218_v42 = vpop.f32.mrf.mxu3  ;;  %v1163_v45 = vpop.f32.mrf.mxu1 }
  0xfa   : > { %v1134_v43 = vpop.f32.mrf.mxu0 }
  0xfb   : > { %v3199_v46 = vadd.f32 %v1218_v42, %v1190_v41  ;;  %v1164_v47 = vadd.f32 %v1163_v45, %v1134_v43 }
  0xfc   : > { %1394 = vmatmul.bf16.gmra.mxu1 %v3039_v17 }
  0xfd   : > { %1365 = vmatmul.bf16.gmra.mxu0 %v3037_v16  ;;  %1423 = vmatmul.bf16.gmra.mxu2 %v3041_v18 }
  0xfe   : > { %1452 = vmatmul.bf16.gmra.mxu3 %v3043_v19 }
 0x100   : > { %v1192_v49 = vpop.f32.mrf.mxu2 }
 0x101   : > { %v1193_v52 = vadd.f32 %v1192_v49, %v1164_v47  ;;  %v1221_v55 = vpop.f32.mrf.mxu3  ;;  %v1165_v59 = vpop.f32.mrf.mxu1 }
 0x102   : > { %v1136_v58 = vpop.f32.mrf.mxu0 }
 0x103   : > { %v3205_v61 = vadd.f32 %v1221_v55, %v1193_v52  ;;  %v1166_v62 = vadd.f32 %v1165_v59, %v1136_v58 }
 0x108   : > { %v1194_v63 = vpop.f32.mrf.mxu2 }
 0x109   : > { %v1195_v0 = vadd.f32 %v1194_v63, %v1166_v62  ;;  %v1223_v1 = vpop.f32.mrf.mxu3  ;;  %v1264_v3 = vpop.f32.mrf.mxu1 }
 0x10a   : > { %v1235_v2 = vpop.f32.mrf.mxu0 }
 0x10b   : > { %v3207_v4 = vadd.f32 %v1223_v1, %v1195_v0  ;;  %v1265_v5 = vadd.f32 %v1264_v3, %v1235_v2 }
 0x10c   : > { %1495 = vmatmul.bf16.vlgmr.msrb.gmra.mxu1 %v2933_v53 }
 0x10d   : > { %1466 = vmatmul.bf16.vlgmr.msrb.gmra.mxu0 %v2928_v48  ;;  %1524 = vmatmul.bf16.vlgmr.msrb.gmra.mxu2 %v2935_v54 }
 0x10e   : > { %1553 = vmatmul.bf16.vlgmr.msrb.gmra.mxu3 %v2939_v57 }
 0x110   : > { %v1293_v7 = vpop.f32.mrf.mxu2 }
 0x111   : > { %v1294_v8 = vadd.f32 %v1293_v7, %v1265_v5  ;;  %v1322_v9 = vpop.f32.mrf.mxu3  ;;  %v1266_v11 = vpop.f32.mrf.mxu1 }
 0x112   : > { %v1237_v10 = vpop.f32.mrf.mxu0 }
 0x113   : > { %v1323_v12 = vadd.f32 %v1322_v9, %v1294_v8  ;;  %v1267_v48 = vadd.f32 %v1266_v11, %v1237_v10 }
 0x115   : > { %v1673_v13 = vpack.c.bf16 %v1323_v12, %v3153_v6 }
 0x117   : > { %1689 = vst [vmem:[%s3215_s19] sm:$0xff] %v1673_v13 }
 0x118   : > { %v1295_v53 = vpop.f32.mrf.mxu2 }
 0x119   : > { %v1296_v14 = vadd.f32 %v1295_v53, %v1267_v48  ;;  %v1324_v54 = vpop.f32.mrf.mxu3  ;;  %v1269_v57 = vpop.f32.mrf.mxu1 }
 0x11a   : > { %v1240_v15 = vpop.f32.mrf.mxu0 }
 0x11b   : > { %v1325_v20 = vadd.f32 %v1324_v54, %v1296_v14  ;;  %v1270_v22 = vadd.f32 %v1269_v57, %v1240_v15 }
 0x11c   : > { %1500 = vmatmul.bf16.gmra.mxu1 %v2977_v50 }
 0x11d   : > { %1471 = vmatmul.bf16.gmra.mxu0 %v2972_v44  ;;  %v1675_v21 = vpack.c.bf16 %v1325_v20, %v3163_v29  ;;  %1529 = vmatmul.bf16.gmra.mxu2 %v2979_v51 }
 0x11e   : > { %1558 = vmatmul.bf16.gmra.mxu3 %v2983_v56 }
 0x11f   : > { %1691 = vst [vmem:[%s3215_s19 + $0x10] sm:$0xff] %v1675_v21 }
 0x120   : > { %v1298_v6 = vpop.f32.mrf.mxu2 }
 0x121   : > { %v1299_v23 = vadd.f32 %v1298_v6, %v1270_v22  ;;  %v1327_v24 = vpop.f32.mrf.mxu3  ;;  %v1271_v27 = vpop.f32.mrf.mxu1 }
 0x122   : > { %v1242_v25 = vpop.f32.mrf.mxu0 }
 0x123   : > { %v1328_v28 = vadd.f32 %v1327_v24, %v1299_v23  ;;  %v1272_v44 = vadd.f32 %v1271_v27, %v1242_v25 }
 0x125   : > { %v1677_v30 = vpack.c.bf16 %v1328_v28, %v3177_v60 }
 0x127   : > { %1693 = vst [vmem:[%s3215_s19 + $0x20] sm:$0xff] %v1677_v30 }
 0x128   : > { %v1300_v29 = vpop.f32.mrf.mxu2 }
 0x129   : > { %v1301_v31 = vadd.f32 %v1300_v29, %v1272_v44  ;;  %v1329_v32 = vpop.f32.mrf.mxu3  ;;  %v1274_v33 = vpop.f32.mrf.mxu1 }
 0x12a   : > { %v1245_v50 = vpop.f32.mrf.mxu0 }
 0x12b   : > { %v1330_v51 = vadd.f32 %v1329_v32, %v1301_v31  ;;  %v1275_v35 = vadd.f32 %v1274_v33, %v1245_v50 }
 0x12c   : > { %1505 = vmatmul.bf16.gmra.mxu1 %v3011_v37 }
 0x12d   : > { %1476 = vmatmul.bf16.gmra.mxu0 %v3009_v36  ;;  %v1679_v56 = vpack.c.bf16 %v1330_v51, %v3191_v26  ;;  %1534 = vmatmul.bf16.gmra.mxu2 %v3013_v38 }
 0x12e   : > { %1563 = vmatmul.bf16.gmra.mxu3 %v3015_v39 }
 0x12f   : > { %1695 = vst [vmem:[%s3215_s19 + $0x30] sm:$0xff] %v1679_v56 }
 0x130   : > { %v1303_v60 = vpop.f32.mrf.mxu2 }
 0x131   : > { %v1304_v40 = vadd.f32 %v1303_v60, %v1275_v35  ;;  %v1332_v41 = vpop.f32.mrf.mxu3  ;;  %v1276_v43 = vpop.f32.mrf.mxu1 }
 0x132   : > { %v1247_v42 = vpop.f32.mrf.mxu0 }
 0x133   : > { %v1333_v45 = vadd.f32 %v1332_v41, %v1304_v40  ;;  %v1277_v36 = vadd.f32 %v1276_v43, %v1247_v42 }
 0x135   : > { %v1681_v47 = vpack.c.bf16 %v1333_v45, %v3197_v34 }
 0x137   : > { %1697 = vst [vmem:[%s3215_s19 + $0x40] sm:$0xff] %v1681_v47 }
 0x138   : > { %v1305_v26 = vpop.f32.mrf.mxu2 }
 0x139   : > { %v1306_v49 = vadd.f32 %v1305_v26, %v1277_v36  ;;  %v1334_v52 = vpop.f32.mrf.mxu3  ;;  %v1279_v55 = vpop.f32.mrf.mxu1 }
 0x13a   : > { %v1250_v37 = vpop.f32.mrf.mxu0 }
 0x13b   : > { %v1335_v38 = vadd.f32 %v1334_v52, %v1306_v49  ;;  %v1280_v58 = vadd.f32 %v1279_v55, %v1250_v37 }
 0x13c   : > { %1510 = vmatmul.bf16.gmra.mxu1 %v3039_v17 }
 0x13d   : > { %1481 = vmatmul.bf16.gmra.mxu0 %v3037_v16  ;;  %v1683_v39 = vpack.c.bf16 %v1335_v38, %v3199_v46  ;;  %1539 = vmatmul.bf16.gmra.mxu2 %v3041_v18 }
 0x13e   : > { %1568 = vmatmul.bf16.gmra.mxu3 %v3043_v19 }
 0x13f   : > { %1699 = vst [vmem:[%s3215_s19 + $0x50] sm:$0xff] %v1683_v39 }
 0x140   : > { %v1308_v34 = vpop.f32.mrf.mxu2 }
 0x141   : > { %v1309_v59 = vadd.f32 %v1308_v34, %v1280_v58  ;;  %v1337_v62 = vpop.f32.mrf.mxu3  ;;  %v1281_v0 = vpop.f32.mrf.mxu1 }
 0x142   : > { %v1252_v63 = vpop.f32.mrf.mxu0 }
 0x143   : > { %v1338_v1 = vadd.f32 %v1337_v62, %v1309_v59  ;;  %v1282_v16 = vadd.f32 %v1281_v0, %v1252_v63 }
 0x145   : > { %v1685_v2 = vpack.c.bf16 %v1338_v1, %v3205_v61 }
 0x147   : > { %1701 = vst [vmem:[%s3215_s19 + $0x60] sm:$0xff] %v1685_v2 }
 0x148   : > { %v1310_v46 = vpop.f32.mrf.mxu2 }
 0x149   : > { %v1311_v3 = vadd.f32 %v1310_v46, %v1282_v16  ;;  %v1339_v5 = vpop.f32.mrf.mxu3  ;;  %v1380_v7 = vpop.f32.mrf.mxu1 }
 0x14a   : > { %v1351_v17 = vpop.f32.mrf.mxu0 }
 0x14b   : > { %v1340_v18 = vadd.f32 %v1339_v5, %v1311_v3  ;;  %v1381_v8 = vadd.f32 %v1380_v7, %v1351_v17 }
 0x14d   : > { %v1687_v19 = vpack.c.bf16 %v1340_v18, %v3207_v4 }
 0x14f   : > { %1703 = vst [vmem:[%s3215_s19 + $0x70] sm:$0xff] %v1687_v19 }
 0x150   : > { %v1409_v9 = vpop.f32.mrf.mxu2 }
 0x151   : > { %v1410_v10 = vadd.f32 %v1409_v9, %v1381_v8  ;;  %v1438_v11 = vpop.f32.mrf.mxu3  ;;  %v1382_v13 = vpop.f32.mrf.mxu1 }
 0x152   : > { %v1353_v12 = vpop.f32.mrf.mxu0 }
 0x153   : > { %v1439_v48 = vadd.f32 %v1438_v11, %v1410_v10  ;;  %v1383_v53 = vadd.f32 %v1382_v13, %v1353_v12 }
 0x158   : > { %v1411_v61 = vpop.f32.mrf.mxu2 }
 0x159   : > { %v1412_v14 = vadd.f32 %v1411_v61, %v1383_v53  ;;  %v1440_v54 = vpop.f32.mrf.mxu3  ;;  %v1385_v57 = vpop.f32.mrf.mxu1 }
 0x15a   : > { %v1356_v15 = vpop.f32.mrf.mxu0 }
 0x15b   : > { %v1441_v20 = vadd.f32 %v1440_v54, %v1412_v14  ;;  %v1386_v21 = vadd.f32 %v1385_v57, %v1356_v15 }
 0x160   : > { %v1414_v22 = vpop.f32.mrf.mxu2 }
 0x161   : > { %v1415_v6 = vadd.f32 %v1414_v22, %v1386_v21  ;;  %v1443_v23 = vpop.f32.mrf.mxu3  ;;  %v1387_v4 = vpop.f32.mrf.mxu1 }
 0x162   : > { %v1358_v24 = vpop.f32.mrf.mxu0 }
 0x163   : > { %v1444_v25 = vadd.f32 %v1443_v23, %v1415_v6  ;;  %v1388_v27 = vadd.f32 %v1387_v4, %v1358_v24 }
 0x168   : > { %v1416_v28 = vpop.f32.mrf.mxu2 }
 0x169   : > { %v1417_v30 = vadd.f32 %v1416_v28, %v1388_v27  ;;  %v1445_v44 = vpop.f32.mrf.mxu3  ;;  %v1390_v31 = vpop.f32.mrf.mxu1 }
 0x16a   : > { %v1361_v29 = vpop.f32.mrf.mxu0 }
 0x16b   : > { %v3244_v32 = vadd.f32 %v1445_v44, %v1417_v30  ;;  %v1391_v50 = vadd.f32 %v1390_v31, %v1361_v29 }
 0x170   : > { %v1419_v33 = vpop.f32.mrf.mxu2 }
 0x171   : > { %v1420_v51 = vadd.f32 %v1419_v33, %v1391_v50  ;;  %v1448_v56 = vpop.f32.mrf.mxu3  ;;  %v1392_v60 = vpop.f32.mrf.mxu1 }
 0x172   : > { %v1363_v35 = vpop.f32.mrf.mxu0 }
 0x173   : > { %v3246_v40 = vadd.f32 %v1448_v56, %v1420_v51  ;;  %v1393_v41 = vadd.f32 %v1392_v60, %v1363_v35 }
 0x178   : > { %v1421_v42 = vpop.f32.mrf.mxu2 }
 0x179   : > { %v1422_v43 = vadd.f32 %v1421_v42, %v1393_v41  ;;  %v1450_v45 = vpop.f32.mrf.mxu3  ;;  %v1395_v36 = vpop.f32.mrf.mxu1 }
 0x17a   : > { %v1366_v47 = vpop.f32.mrf.mxu0 }
 0x17b   : > { %v3248_v26 = vadd.f32 %v1450_v45, %v1422_v43  ;;  %v1396_v49 = vadd.f32 %v1395_v36, %v1366_v47 }
 0x180   : > { %v1424_v52 = vpop.f32.mrf.mxu2 }
 0x181   : > { %v1425_v37 = vadd.f32 %v1424_v52, %v1396_v49  ;;  %v1453_v55 = vpop.f32.mrf.mxu3  ;;  %v1397_v39 = vpop.f32.mrf.mxu1 }
 0x182   : > { %v1368_v38 = vpop.f32.mrf.mxu0 }
 0x183   : > { %v3250_v58 = vadd.f32 %v1453_v55, %v1425_v37  ;;  %v1398_v34 = vadd.f32 %v1397_v39, %v1368_v38 }
 0x188   : > { %v1426_v59 = vpop.f32.mrf.mxu2 }
 0x189   : > { %v1427_v62 = vadd.f32 %v1426_v59, %v1398_v34  ;;  %v1455_v63 = vpop.f32.mrf.mxu3  ;;  %v1496_v1 = vpop.f32.mrf.mxu1 }
 0x18a   : > { %v1467_v0 = vpop.f32.mrf.mxu0 }
 0x18b   : > { %v3252_v2 = vadd.f32 %v1455_v63, %v1427_v62  ;;  %v1497_v16 = vadd.f32 %v1496_v1, %v1467_v0 }
 0x190   : > { %v1525_v46 = vpop.f32.mrf.mxu2 }
 0x191   : > { %v1526_v3 = vadd.f32 %v1525_v46, %v1497_v16  ;;  %v1554_v5 = vpop.f32.mrf.mxu3  ;;  %v1498_v7 = vpop.f32.mrf.mxu1 }
 0x192   : > { %v1469_v17 = vpop.f32.mrf.mxu0 }
 0x193   : > { %v1555_v18 = vadd.f32 %v1554_v5, %v1526_v3  ;;  %v1499_v19 = vadd.f32 %v1498_v7, %v1469_v17 }
 0x195   : > { %v1674_v8 = vpack.c.bf16 %v1555_v18, %v1439_v48 }
 0x197   : > { %1690 = vst [vmem:[%s3215_s19 + $0x8] sm:$0xff] %v1674_v8 }
 0x198   : > { %v1527_v9 = vpop.f32.mrf.mxu2 }
 0x199   : > { %v1528_v10 = vadd.f32 %v1527_v9, %v1499_v19  ;;  %v1556_v11 = vpop.f32.mrf.mxu3  ;;  %v1501_v13 = vpop.f32.mrf.mxu1 }
 0x19a   : > { %v1472_v12 = vpop.f32.mrf.mxu0 }
 0x19b   : > { %v1557_v53 = vadd.f32 %v1556_v11, %v1528_v10  ;;  %v1502_v14 = vadd.f32 %v1501_v13, %v1472_v12 }
 0x19d   : > { %v1676_v61 = vpack.c.bf16 %v1557_v53, %v1441_v20 }
 0x19f   : > { %1692 = vst [vmem:[%s3215_s19 + $0x18] sm:$0xff] %v1676_v61 }
 0x1a0   : > { %v1530_v54 = vpop.f32.mrf.mxu2 }
 0x1a1   : > { %v1531_v15 = vadd.f32 %v1530_v54, %v1502_v14  ;;  %v1559_v57 = vpop.f32.mrf.mxu3  ;;  %v1503_v22 = vpop.f32.mrf.mxu1 }
 0x1a2   : > { %v1474_v21 = vpop.f32.mrf.mxu0 }
 0x1a3   : > { %v1560_v6 = vadd.f32 %v1559_v57, %v1531_v15  ;;  %v1504_v23 = vadd.f32 %v1503_v22, %v1474_v21 }
 0x1a5   : > { %v1678_v48 = vpack.c.bf16 %v1560_v6, %v1444_v25 }
 0x1a7   : > { %1694 = vst [vmem:[%s3215_s19 + $0x28] sm:$0xff] %v1678_v48 }
 0x1a8   : > { %v1532_v24 = vpop.f32.mrf.mxu2 }
 0x1a9   : > { %v1533_v4 = vadd.f32 %v1532_v24, %v1504_v23  ;;  %v1561_v27 = vpop.f32.mrf.mxu3  ;;  %v1506_v30 = vpop.f32.mrf.mxu1 }
 0x1aa   : > { %v1477_v28 = vpop.f32.mrf.mxu0 }
 0x1ab   : > { %v1562_v44 = vadd.f32 %v1561_v27, %v1533_v4  ;;  %v1507_v29 = vadd.f32 %v1506_v30, %v1477_v28 }
 0x1ad   : > { %v1680_v20 = vpack.c.bf16 %v1562_v44, %v3244_v32 }
 0x1af   : > { %1696 = vst [vmem:[%s3215_s19 + $0x38] sm:$0xff] %v1680_v20 }
 0x1b0   : > { %v1535_v31 = vpop.f32.mrf.mxu2 }
 0x1b1   : > { %v1536_v50 = vadd.f32 %v1535_v31, %v1507_v29  ;;  %v1564_v33 = vpop.f32.mrf.mxu3  ;;  %v1508_v56 = vpop.f32.mrf.mxu1 }
 0x1b2   : > { %v1479_v51 = vpop.f32.mrf.mxu0 }
 0x1b3   : > { %v1565_v25 = vadd.f32 %v1564_v33, %v1536_v50  ;;  %v1509_v60 = vadd.f32 %v1508_v56, %v1479_v51 }
 0x1b5   : > { %v1682_v35 = vpack.c.bf16 %v1565_v25, %v3246_v40 }
 0x1b7   : > { %1698 = vst [vmem:[%s3215_s19 + $0x48] sm:$0xff] %v1682_v35 }
 0x1b8   : > { %v1537_v41 = vpop.f32.mrf.mxu2 }
 0x1b9   : > { %v1538_v42 = vadd.f32 %v1537_v41, %v1509_v60  ;;  %v1566_v43 = vpop.f32.mrf.mxu3  ;;  %v1511_v32 = vpop.f32.mrf.mxu1 }
 0x1ba   : > { %v1482_v45 = vpop.f32.mrf.mxu0 }
 0x1bb   : > { %v1567_v47 = vadd.f32 %v1566_v43, %v1538_v42  ;;  %v1512_v49 = vadd.f32 %v1511_v32, %v1482_v45 }
 0x1bd   : > { %v1684_v36 = vpack.c.bf16 %v1567_v47, %v3248_v26 }
 0x1bf   : > { %1700 = vst [vmem:[%s3215_s19 + $0x58] sm:$0xff] %v1684_v36 }
 0x1c0   : > { %v1540_v52 = vpop.f32.mrf.mxu2 }
 0x1c1   : > { %v1541_v37 = vadd.f32 %v1540_v52, %v1512_v49  ;;  %v1569_v55 = vpop.f32.mrf.mxu3  ;;  %v1513_v39 = vpop.f32.mrf.mxu1 }
 0x1c2   : > { %v1484_v40 = vpop.f32.mrf.mxu0 }
 0x1c3   : > { %v1570_v38 = vadd.f32 %v1569_v55, %v1541_v37  ;;  %v1514_v59 = vadd.f32 %v1513_v39, %v1484_v40 }
 0x1c5   : > { %v1686_v34 = vpack.c.bf16 %v1570_v38, %v3250_v58 }
 0x1c7   : > { %1702 = vst [vmem:[%s3215_s19 + $0x68] sm:$0xff] %v1686_v34 }
 0x1c8   : > { %v1542_v26 = vpop.f32.mrf.mxu2 }
 0x1c9   : > { %v1543_v62 = vadd.f32 %v1542_v26, %v1514_v59  ;;  %v1571_v63 = vpop.f32.mrf.mxu3 }
 0x1cb   : > { %v1572_v0 = vadd.f32 %v1571_v63, %v1543_v62 }
 0x1cd   : > { %v1688_v1 = vpack.c.bf16 %v1572_v0, %v3252_v2 }
 0x1cf   : > { %1704 = vst [vmem:[%s3215_s19 + $0x78] sm:$0xff] %v1688_v1 }
 0x1d0   : > { %2657 = shalt.err (!%p2654_p0)
}
 0x1d1   : > { %s2723_s30 = smov 256   ;;  %s2724_s6 = smov 512  }
 0x1d2   : > { %s2725_s7 = smov 16  }
 0x1d3   : > { %2496 = dma.vmem_to_hbm [thread:$0]  (%p2822_p5), %s1722_s21, 2048, %s1724_s22, %s1706_s12, %s2723_s30, %s2724_s6, %s2725_s7  }
 0x1d4 PF: > { %s1738_s17 = sand.u32 1, %s2696_s9   ;;  %p2507_p3 = pnand %p1835_p11, %p2790_p6 }
 0x1d5   : > { %s1739_s19 = scalar_lea.sflag [#allocation5], %s1738_s17 }
 0x1d6   : > { %p2508_p7 = pneg %p2507_p3 }
 0x1d8   : > { %2691 = dma.done.wait (%p2508_p7), %s1739_s19, 2048  }
 0x1d9   : > { %2693 = vsyncadd (%p2508_p7), %s1739_s19, 4294965248  ;;  %s19_s14 = sadd.s32 1, %s2716_s14   ;;  %s3318_s9 = smov %s2700_s10 }
 0x1da   : > { %p16_p9 = scmp.ge.s32.totalorder %s19_s14, 4   ;;  %s3319_s10 = smov %s2704_s11 }
 0x1db   : > { %s3320_s11 = smov %s2831_s8  ;;  %s3321_s12 = smov %s2712_s13 }
 0x1dc   : > { %s3322_s13 = smov %s3324_s29  ;;  %18 = sbr.rel (!%p16_p9) target bundleno = 7 (0x7), region = 87 }
 0x1e1   :  { %1745 = vsyncpa [#allocation4], 1 }
 0x1e2   :  { %1747 = vsyncpa [#allocation4 + $0x1], 1 }
 0x1e3   :  { %1748 = vsyncpa [#allocation7], 1 }
 0x1e4   :  { %1750 = vsyncpa [#allocation7 + $0x1], 1 }
 0x1e5   :  { %1751 = vsyncpa [#allocation5], 1 }
 0x1e6   :  { %1753 = vsyncpa [#allocation5 + $0x1], 1 }

</bundles_post_ra>
